<compile_context>
chip_gen: v5e
topology: v5e:2x2
jax: 0.10.0
libtpu: 0.0.40
codegen_flags: <defaults>
</compile_context>

<pallas_src>
import jax
import jax.numpy as jnp
from jax import lax
from jax.experimental import pallas as pl
from jax.experimental.pallas import tpu as pltpu


def _lstm_reg_kernel(x_ref, wih0_ref, b0_ref, whh0_ref,
                     wih1_ref, b1_ref, whh1_ref, wreg_ref, breg_ref,
                     out_ref,
                     h0, c0, h1, c1, h_stage):
    chunk = pl.program_id(0)

    @pl.when(chunk == 0)
    def _init():
        h0[...] = jnp.zeros_like(h0)
        c0[...] = jnp.zeros_like(c0)
        h1[...] = jnp.zeros_like(h1)
        c1[...] = jnp.zeros_like(c1)

    B, H = h0.shape                 # (batch, hidden)           -- static
    TB = x_ref.shape[0]             # chunk_len * batch          -- static
    T = TB // B                     # timesteps in this chunk    -- static
    O = out_ref.shape[-1]           # output features            -- static

    def gates(z, c):
        # Full 4H-lane EUP passes first, slice gates afterwards
        # (PyTorch gate row order is [i, f, g, o]).
        sig = jax.nn.sigmoid(z)
        tnh = jnp.tanh(z)
        i_g = sig[:, 0:H]
        f_g = sig[:, H:2 * H]
        g_g = tnh[:, 2 * H:3 * H]
        o_g = sig[:, 3 * H:4 * H]
        c_new = f_g * c + i_g * g_g
        h_new = o_g * jnp.tanh(c_new)
        return h_new, c_new

    # ---------------- layer 0 ----------------
    # Batched input projection for the whole chunk (off the critical path):
    # (T*B, I) @ (I, 4H) + (b_ih0 + b_hh0).
    xz0 = jnp.dot(x_ref[...], wih0_ref[...],
                  preferred_element_type=jnp.float32) + b0_ref[...]
    whh0 = whh0_ref[...]
    h0_v, c0_v = h0[...], c0[...]
    for t in range(T):              # statically unrolled (T is small)
        z = xz0[t * B:(t + 1) * B, :] + jnp.dot(
            h0_v, whh0, preferred_element_type=jnp.float32)
        h0_v, c0_v = gates(z, c0_v)
        h_stage[t * B:(t + 1) * B, :] = h0_v      # stage h0 for layer 1
    h0[...] = h0_v
    c0[...] = c0_v

    # ---------------- layer 1 ----------------
    # Batched input projection over the staged layer-0 outputs:
    # (T*B, H) @ (H, 4H) + (b_ih1 + b_hh1).
    xz1 = jnp.dot(h_stage[...], wih1_ref[...],
                  preferred_element_type=jnp.float32) + b1_ref[...]
    whh1 = whh1_ref[...]
    h1_v, c1_v = h1[...], c1[...]
    for t in range(T):
        z = xz1[t * B:(t + 1) * B, :] + jnp.dot(
            h1_v, whh1, preferred_element_type=jnp.float32)
        h1_v, c1_v = gates(z, c1_v)
        h_stage[t * B:(t + 1) * B, :] = h1_v      # reuse staging scratch
    h1[...] = h1_v
    c1[...] = c1_v

    # ---------------- linear head (once per chunk) ----------------
    h1_all = h_stage[...]                          # (T*B, H)
    if O == 1:
        # Avoid a 1-column MXU dot: VPU multiply + lane reduce (XLU idle).
        y = jnp.sum(h1_all * wreg_ref[...], axis=-1, keepdims=True)
    else:
        y = jnp.dot(h1_all, wreg_ref[...].T,
                    preferred_element_type=jnp.float32)
    out_ref[...] = y + breg_ref[...]


def _prepare_kernel_params(torch_params):
    """Transpose / fuse PyTorch-layout LSTM+Linear params for the kernel."""
    (wih0, whh0, bih0, bhh0,
     wih1, whh1, bih1, bhh1, wreg, breg) = torch_params
    return (wih0.T,                      # (I, 4H)
            (bih0 + bhh0)[None, :],      # (1, 4H)
            whh0.T,                      # (H, 4H)
            wih1.T,                      # (H, 4H)
            (bih1 + bhh1)[None, :],      # (1, 4H)
            whh1.T,                      # (H, 4H)
            wreg,                        # (O, H)
            breg[None, :])               # (1, O)


def lstm_reg_forward(x, torch_params, *, chunk_len=None):
    """x: (S, B, I) float32.  Returns (S, B, O) float32."""
    S, B, I = x.shape
    if chunk_len is None:
        chunk_len = S                    # S=8 -> single chunk, grid=(1,)
    assert S % chunk_len == 0, "chunk_len must divide S"
    n_chunks = S // chunk_len

    (wih0T, b0, whh0T, wih1T, b1, whh1T,
     wreg, breg2) = _prepare_kernel_params(torch_params)
    H = whh0T.shape[0]
    O = wreg.shape[0]

    # Rows ordered [chunk, t-within-chunk, b]; wrapper-side reshape only.
    x_flat = x.reshape(n_chunks, chunk_len * B, I)

    def full(arr):
        nd = arr.ndim
        return pl.BlockSpec(arr.shape, lambda c, _n=nd: (0,) * _n)

    out = pl.pallas_call(
        _lstm_reg_kernel,
        out_shape=jax.ShapeDtypeStruct((n_chunks, chunk_len * B, O),
                                       jnp.float32),
        grid_spec=pltpu.PrefetchScalarGridSpec(
            num_scalar_prefetch=0,
            grid=(n_chunks,),
            in_specs=[
                pl.BlockSpec((pl.Squeezed(), chunk_len * B, I),
                             lambda c: (c, 0, 0)),       # x chunk
                full(wih0T),   # W_ih_l0^T                (I, 4H)
                full(b0),      # b_ih_l0 + b_hh_l0        (1, 4H)
                full(whh0T),   # W_hh_l0^T                (H, 4H)
                full(wih1T),   # W_ih_l1^T                (H, 4H)
                full(b1),      # b_ih_l1 + b_hh_l1        (1, 4H)
                full(whh1T),   # W_hh_l1^T                (H, 4H)
                full(wreg),    # W_reg                    (O, H)
                full(breg2),   # b_reg                    (1, O)
            ],
            out_specs=pl.BlockSpec((pl.Squeezed(), chunk_len * B, O),
                                   lambda c: (c, 0, 0)),
            scratch_shapes=[
                pltpu.VMEM((B, H), jnp.float32),              # h layer 0
                pltpu.VMEM((B, H), jnp.float32),              # c layer 0
                pltpu.VMEM((B, H), jnp.float32),              # h layer 1
                pltpu.VMEM((B, H), jnp.float32),              # c layer 1
                pltpu.VMEM((chunk_len * B, H), jnp.float32),  # h staging
            ],
        ),
        compiler_params=pltpu.CompilerParams(
            # Time recurrence carries state in VMEM scratch -> must stay
            # sequential.  Never mark this axis "parallel".
            dimension_semantics=("arbitrary",)),
    )(x_flat, wih0T, b0, whh0T, wih1T, b1, whh1T, wreg, breg2)

    # (n_chunks, chunk_len*B, O) rows are [chunk, t, b] major->minor, so a
    # plain reshape recovers the PyTorch (S, B, O) layout.
    return out.reshape(S, B, O)


def lstm_reg_reference(x, torch_params):
    """Pure-JAX reference with PyTorch-layout params (nn.LSTM + nn.Linear)."""
    (wih0, whh0, bih0, bhh0,
     wih1, whh1, bih1, bhh1, wreg, breg) = torch_params
    S, B, _ = x.shape
    H = whh0.shape[1]

    def cell(x_in, h, c, wih, whh, bih, bhh):
        z = x_in @ wih.T + h @ whh.T + bih + bhh
        i_g = jax.nn.sigmoid(z[:, 0:H])
        f_g = jax.nn.sigmoid(z[:, H:2 * H])
        g_g = jnp.tanh(z[:, 2 * H:3 * H])
        o_g = jax.nn.sigmoid(z[:, 3 * H:4 * H])
        c_new = f_g * c + i_g * g_g
        h_new = o_g * jnp.tanh(c_new)
        return h_new, c_new

    def step(carry, x_t):
        h0, c0, h1, c1 = carry
        h0, c0 = cell(x_t, h0, c0, wih0, whh0, bih0, bhh0)
        h1, c1 = cell(h0, h1, c1, wih1, whh1, bih1, bhh1)
        y = h1 @ wreg.T + breg
        return (h0, c0, h1, c1), y

    z = jnp.zeros((B, H), jnp.float32)
    _, ys = lax.scan(step, (z, z, z, z), x)
    return ys  # (S, B, O)


def init_params(key, input_size, hidden_size, output_size):
    """Deterministic init with PyTorch nn.LSTM / nn.Linear shapes."""
    k = 1.0 / jnp.sqrt(hidden_size)
    keys = jax.random.split(key, 10)
    u = lambda kk, shape: jax.random.uniform(kk, shape, jnp.float32, -k, k)
    wih0 = u(keys[0], (4 * hidden_size, input_size))
    whh0 = u(keys[1], (4 * hidden_size, hidden_size))
    bih0 = u(keys[2], (4 * hidden_size,))
    bhh0 = u(keys[3], (4 * hidden_size,))
    wih1 = u(keys[4], (4 * hidden_size, hidden_size))
    whh1 = u(keys[5], (4 * hidden_size, hidden_size))
    bih1 = u(keys[6], (4 * hidden_size,))
    bhh1 = u(keys[7], (4 * hidden_size,))
    wreg = u(keys[8], (output_size, hidden_size))
    breg = u(keys[9], (output_size,))
    return (wih0, whh0, bih0, bhh0, wih1, whh1, bih1, bhh1, wreg, breg)


if __name__ == "__main__":
    S, B, I, H, O = 8, 2, 4, 32, 1

    key = jax.random.PRNGKey(0)
    kx, kp = jax.random.split(key)
    x = jax.random.normal(kx, (S, B, I), jnp.float32)
    params = init_params(kp, I, H, O)

    out = lstm_reg_forward(x, params)
    out = jax.block_until_ready(out)

    ref = lstm_reg_reference(x, params)
    assert out.shape == (S, B, O)
    assert jnp.allclose(out, ref, atol=1e-4, rtol=1e-4), (
        f"max abs err = {jnp.max(jnp.abs(out - ref))}")

    print("KERNEL_OK")
</pallas_src>

<mosaic_0001>
module attributes {stable_mosaic.version = 11 : i64} {
  func.func @_lstm_reg_kernel(%arg0: i32, %arg1: memref<1x16x4xf32, #tpu.memory_space<vmem>>, %arg2: memref<4x128xf32, #tpu.memory_space<vmem>>, %arg3: memref<1x128xf32, #tpu.memory_space<vmem>>, %arg4: memref<32x128xf32, #tpu.memory_space<vmem>>, %arg5: memref<32x128xf32, #tpu.memory_space<vmem>>, %arg6: memref<1x128xf32, #tpu.memory_space<vmem>>, %arg7: memref<32x128xf32, #tpu.memory_space<vmem>>, %arg8: memref<1x32xf32, #tpu.memory_space<vmem>>, %arg9: memref<1x1xf32, #tpu.memory_space<vmem>>, %arg10: memref<1x16x1xf32, #tpu.memory_space<vmem>>, %arg11: memref<2x32xf32, #tpu.memory_space<vmem>>, %arg12: memref<2x32xf32, #tpu.memory_space<vmem>>, %arg13: memref<2x32xf32, #tpu.memory_space<vmem>>, %arg14: memref<2x32xf32, #tpu.memory_space<vmem>>, %arg15: memref<16x32xf32, #tpu.memory_space<vmem>>) attributes {dimension_semantics = [#tpu.dimension_semantics<arbitrary>], iteration_bounds = array<i64: 1>, scalar_prefetch = 0 : i64, scratch_operands = 5 : i64, tpu.core_type = #tpu.core_type<tc>, window_params = [{transform_indices = @transform_0, window_bounds = array<i64: 1, 16, 4>}, {pipeline_mode = #tpu.pipeline_mode<synchronous>, transform_indices = @transform_1, window_bounds = array<i64: 4, 128>}, {pipeline_mode = #tpu.pipeline_mode<synchronous>, transform_indices = @transform_2, window_bounds = array<i64: 1, 128>}, {pipeline_mode = #tpu.pipeline_mode<synchronous>, transform_indices = @transform_3, window_bounds = array<i64: 32, 128>}, {pipeline_mode = #tpu.pipeline_mode<synchronous>, transform_indices = @transform_4, window_bounds = array<i64: 32, 128>}, {pipeline_mode = #tpu.pipeline_mode<synchronous>, transform_indices = @transform_5, window_bounds = array<i64: 1, 128>}, {pipeline_mode = #tpu.pipeline_mode<synchronous>, transform_indices = @transform_6, window_bounds = array<i64: 32, 128>}, {pipeline_mode = #tpu.pipeline_mode<synchronous>, transform_indices = @transform_7, window_bounds = array<i64: 1, 32>}, {pipeline_mode = #tpu.pipeline_mode<synchronous>, transform_indices = @transform_8, window_bounds = array<i64: 1, 1>}, {transform_indices = @transform_9, window_bounds = array<i64: 1, 16, 1>}]} {
    %c0_i32 = arith.constant 0 : i32
    %0 = arith.cmpi eq, %arg0, %c0_i32 : i32
    %1 = arith.extui %0 : i1 to i32
    %c0_i32_0 = arith.constant 0 : i32
    %2 = arith.cmpi ne, %1, %c0_i32_0 : i32
    scf.if %2 {
      %cst_101 = arith.constant 0.000000e+00 : f32
      %342 = vector.broadcast %cst_101 : f32 to vector<2x32xf32>
      %c0_102 = arith.constant 0 : index
      %c0_103 = arith.constant 0 : index
      %343 = vector.load %arg11[%c0_102, %c0_103] : memref<2x32xf32, #tpu.memory_space<vmem>>, vector<2x32xf32>
      tpu.vector_store %arg11[%c0_102, %c0_103], %342 {strides = array<i32>} : memref<2x32xf32, #tpu.memory_space<vmem>>, vector<2x32xf32>,
      %cst_104 = arith.constant 0.000000e+00 : f32
      %344 = vector.broadcast %cst_104 : f32 to vector<2x32xf32>
      %c0_105 = arith.constant 0 : index
      %c0_106 = arith.constant 0 : index
      %345 = vector.load %arg12[%c0_105, %c0_106] : memref<2x32xf32, #tpu.memory_space<vmem>>, vector<2x32xf32>
      tpu.vector_store %arg12[%c0_105, %c0_106], %344 {strides = array<i32>} : memref<2x32xf32, #tpu.memory_space<vmem>>, vector<2x32xf32>,
      %cst_107 = arith.constant 0.000000e+00 : f32
      %346 = vector.broadcast %cst_107 : f32 to vector<2x32xf32>
      %c0_108 = arith.constant 0 : index
      %c0_109 = arith.constant 0 : index
      %347 = vector.load %arg13[%c0_108, %c0_109] : memref<2x32xf32, #tpu.memory_space<vmem>>, vector<2x32xf32>
      tpu.vector_store %arg13[%c0_108, %c0_109], %346 {strides = array<i32>} : memref<2x32xf32, #tpu.memory_space<vmem>>, vector<2x32xf32>,
      %cst_110 = arith.constant 0.000000e+00 : f32
      %348 = vector.broadcast %cst_110 : f32 to vector<2x32xf32>
      %c0_111 = arith.constant 0 : index
      %c0_112 = arith.constant 0 : index
      %349 = vector.load %arg14[%c0_111, %c0_112] : memref<2x32xf32, #tpu.memory_space<vmem>>, vector<2x32xf32>
      tpu.vector_store %arg14[%c0_111, %c0_112], %348 {strides = array<i32>} : memref<2x32xf32, #tpu.memory_space<vmem>>, vector<2x32xf32>,
    } else {
    }
    %c0 = arith.constant 0 : index
    %c0_1 = arith.constant 0 : index
    %c0_2 = arith.constant 0 : index
    %3 = vector.load %arg1[%c0, %c0_1, %c0_2] : memref<1x16x4xf32, #tpu.memory_space<vmem>>, vector<1x16x4xf32>
    %4 = vector.shape_cast %3 : vector<1x16x4xf32> to vector<16x4xf32>
    %c0_3 = arith.constant 0 : index
    %c0_4 = arith.constant 0 : index
    %5 = vector.load %arg2[%c0_3, %c0_4] : memref<4x128xf32, #tpu.memory_space<vmem>>, vector<4x128xf32>
    %cst = arith.constant dense<0.000000e+00> : vector<16x128xf32>
    %6 = tpu.matmul %4, %5, %cst {dimension_numbers = #tpu.dot_dimension_numbers<[1], [0], [0], [1], [0, 0, 1, 1], [], []>} : vector<16x4xf32>, vector<4x128xf32>, vector<16x128xf32> -> vector<16x128xf32>
    %c0_5 = arith.constant 0 : index
    %c0_6 = arith.constant 0 : index
    %7 = vector.load %arg3[%c0_5, %c0_6] : memref<1x128xf32, #tpu.memory_space<vmem>>, vector<1x128xf32>
    %8 = vector.broadcast %7 : vector<1x128xf32> to vector<16x128xf32>
    %9 = arith.addf %6, %8 : vector<16x128xf32>
    %c0_7 = arith.constant 0 : index
    %c0_8 = arith.constant 0 : index
    %10 = vector.load %arg4[%c0_7, %c0_8] : memref<32x128xf32, #tpu.memory_space<vmem>>, vector<32x128xf32>
    %c0_9 = arith.constant 0 : index
    %c0_10 = arith.constant 0 : index
    %11 = vector.load %arg11[%c0_9, %c0_10] : memref<2x32xf32, #tpu.memory_space<vmem>>, vector<2x32xf32>
    %c0_11 = arith.constant 0 : index
    %c0_12 = arith.constant 0 : index
    %12 = vector.load %arg12[%c0_11, %c0_12] : memref<2x32xf32, #tpu.memory_space<vmem>>, vector<2x32xf32>
    %13 = vector.extract_strided_slice %9 {offsets = [0, 0], sizes = [2, 128], strides = [1, 1]} : vector<16x128xf32> to vector<2x128xf32>
    %cst_13 = arith.constant dense<0.000000e+00> : vector<2x128xf32>
    %14 = tpu.matmul %11, %10, %cst_13 {dimension_numbers = #tpu.dot_dimension_numbers<[1], [0], [0], [1], [0, 0, 1, 1], [], []>} : vector<2x32xf32>, vector<32x128xf32>, vector<2x128xf32> -> vector<2x128xf32>
    %15 = arith.addf %13, %14 : vector<2x128xf32>
    %16 = arith.negf %15 : vector<2x128xf32>
    %17 = math.exp %16 : vector<2x128xf32>
    %cst_14 = arith.constant 1.000000e+00 : f32
    %18 = vector.broadcast %cst_14 : f32 to vector<2x128xf32>
    %19 = arith.addf %18, %17 : vector<2x128xf32>
    %20 = arith.divf %18, %19 : vector<2x128xf32>
    %21 = math.tanh %15 : vector<2x128xf32>
    %22 = vector.extract_strided_slice %20 {offsets = [0, 0], sizes = [2, 32], strides = [1, 1]} : vector<2x128xf32> to vector<2x32xf32>
    %23 = vector.extract_strided_slice %20 {offsets = [0, 32], sizes = [2, 32], strides = [1, 1]} : vector<2x128xf32> to vector<2x32xf32>
    %24 = vector.extract_strided_slice %21 {offsets = [0, 64], sizes = [2, 32], strides = [1, 1]} : vector<2x128xf32> to vector<2x32xf32>
    %25 = vector.extract_strided_slice %20 {offsets = [0, 96], sizes = [2, 32], strides = [1, 1]} : vector<2x128xf32> to vector<2x32xf32>
    %26 = arith.mulf %23, %12 : vector<2x32xf32>
    %27 = arith.mulf %22, %24 : vector<2x32xf32>
    %28 = arith.addf %26, %27 : vector<2x32xf32>
    %29 = math.tanh %28 : vector<2x32xf32>
    %30 = arith.mulf %25, %29 : vector<2x32xf32>
    %c0_15 = arith.constant 0 : index
    %c0_16 = arith.constant 0 : index
    %31 = vector.load %arg15[%c0_15, %c0_16] : memref<16x32xf32, #tpu.memory_space<vmem>>, vector<2x32xf32>
    tpu.vector_store %arg15[%c0_15, %c0_16], %30 {strides = array<i32>} : memref<16x32xf32, #tpu.memory_space<vmem>>, vector<2x32xf32>,
    %32 = vector.extract_strided_slice %9 {offsets = [2, 0], sizes = [2, 128], strides = [1, 1]} : vector<16x128xf32> to vector<2x128xf32>
    %cst_17 = arith.constant dense<0.000000e+00> : vector<2x128xf32>
    %33 = tpu.matmul %30, %10, %cst_17 {dimension_numbers = #tpu.dot_dimension_numbers<[1], [0], [0], [1], [0, 0, 1, 1], [], []>} : vector<2x32xf32>, vector<32x128xf32>, vector<2x128xf32> -> vector<2x128xf32>
    %34 = arith.addf %32, %33 : vector<2x128xf32>
    %35 = arith.negf %34 : vector<2x128xf32>
    %36 = math.exp %35 : vector<2x128xf32>
    %cst_18 = arith.constant 1.000000e+00 : f32
    %37 = vector.broadcast %cst_18 : f32 to vector<2x128xf32>
    %38 = arith.addf %37, %36 : vector<2x128xf32>
    %39 = arith.divf %37, %38 : vector<2x128xf32>
    %40 = math.tanh %34 : vector<2x128xf32>
    %41 = vector.extract_strided_slice %39 {offsets = [0, 0], sizes = [2, 32], strides = [1, 1]} : vector<2x128xf32> to vector<2x32xf32>
    %42 = vector.extract_strided_slice %39 {offsets = [0, 32], sizes = [2, 32], strides = [1, 1]} : vector<2x128xf32> to vector<2x32xf32>
    %43 = vector.extract_strided_slice %40 {offsets = [0, 64], sizes = [2, 32], strides = [1, 1]} : vector<2x128xf32> to vector<2x32xf32>
    %44 = vector.extract_strided_slice %39 {offsets = [0, 96], sizes = [2, 32], strides = [1, 1]} : vector<2x128xf32> to vector<2x32xf32>
    %45 = arith.mulf %42, %28 : vector<2x32xf32>
    %46 = arith.mulf %41, %43 : vector<2x32xf32>
    %47 = arith.addf %45, %46 : vector<2x32xf32>
    %48 = math.tanh %47 : vector<2x32xf32>
    %49 = arith.mulf %44, %48 : vector<2x32xf32>
    %c2 = arith.constant 2 : index
    %c0_19 = arith.constant 0 : index
    %50 = vector.load %arg15[%c2, %c0_19] : memref<16x32xf32, #tpu.memory_space<vmem>>, vector<2x32xf32>
    tpu.vector_store %arg15[%c2, %c0_19], %49 {strides = array<i32>} : memref<16x32xf32, #tpu.memory_space<vmem>>, vector<2x32xf32>,
    %51 = vector.extract_strided_slice %9 {offsets = [4, 0], sizes = [2, 128], strides = [1, 1]} : vector<16x128xf32> to vector<2x128xf32>
    %cst_20 = arith.constant dense<0.000000e+00> : vector<2x128xf32>
    %52 = tpu.matmul %49, %10, %cst_20 {dimension_numbers = #tpu.dot_dimension_numbers<[1], [0], [0], [1], [0, 0, 1, 1], [], []>} : vector<2x32xf32>, vector<32x128xf32>, vector<2x128xf32> -> vector<2x128xf32>
    %53 = arith.addf %51, %52 : vector<2x128xf32>
    %54 = arith.negf %53 : vector<2x128xf32>
    %55 = math.exp %54 : vector<2x128xf32>
    %cst_21 = arith.constant 1.000000e+00 : f32
    %56 = vector.broadcast %cst_21 : f32 to vector<2x128xf32>
    %57 = arith.addf %56, %55 : vector<2x128xf32>
    %58 = arith.divf %56, %57 : vector<2x128xf32>
    %59 = math.tanh %53 : vector<2x128xf32>
    %60 = vector.extract_strided_slice %58 {offsets = [0, 0], sizes = [2, 32], strides = [1, 1]} : vector<2x128xf32> to vector<2x32xf32>
    %61 = vector.extract_strided_slice %58 {offsets = [0, 32], sizes = [2, 32], strides = [1, 1]} : vector<2x128xf32> to vector<2x32xf32>
    %62 = vector.extract_strided_slice %59 {offsets = [0, 64], sizes = [2, 32], strides = [1, 1]} : vector<2x128xf32> to vector<2x32xf32>
    %63 = vector.extract_strided_slice %58 {offsets = [0, 96], sizes = [2, 32], strides = [1, 1]} : vector<2x128xf32> to vector<2x32xf32>
    %64 = arith.mulf %61, %47 : vector<2x32xf32>
    %65 = arith.mulf %60, %62 : vector<2x32xf32>
    %66 = arith.addf %64, %65 : vector<2x32xf32>
    %67 = math.tanh %66 : vector<2x32xf32>
    %68 = arith.mulf %63, %67 : vector<2x32xf32>
    %c4 = arith.constant 4 : index
    %c0_22 = arith.constant 0 : index
    %69 = vector.load %arg15[%c4, %c0_22] : memref<16x32xf32, #tpu.memory_space<vmem>>, vector<2x32xf32>
    tpu.vector_store %arg15[%c4, %c0_22], %68 {strides = array<i32>} : memref<16x32xf32, #tpu.memory_space<vmem>>, vector<2x32xf32>,
    %70 = vector.extract_strided_slice %9 {offsets = [6, 0], sizes = [2, 128], strides = [1, 1]} : vector<16x128xf32> to vector<2x128xf32>
    %cst_23 = arith.constant dense<0.000000e+00> : vector<2x128xf32>
    %71 = tpu.matmul %68, %10, %cst_23 {dimension_numbers = #tpu.dot_dimension_numbers<[1], [0], [0], [1], [0, 0, 1, 1], [], []>} : vector<2x32xf32>, vector<32x128xf32>, vector<2x128xf32> -> vector<2x128xf32>
    %72 = arith.addf %70, %71 : vector<2x128xf32>
    %73 = arith.negf %72 : vector<2x128xf32>
    %74 = math.exp %73 : vector<2x128xf32>
    %cst_24 = arith.constant 1.000000e+00 : f32
    %75 = vector.broadcast %cst_24 : f32 to vector<2x128xf32>
    %76 = arith.addf %75, %74 : vector<2x128xf32>
    %77 = arith.divf %75, %76 : vector<2x128xf32>
    %78 = math.tanh %72 : vector<2x128xf32>
    %79 = vector.extract_strided_slice %77 {offsets = [0, 0], sizes = [2, 32], strides = [1, 1]} : vector<2x128xf32> to vector<2x32xf32>
    %80 = vector.extract_strided_slice %77 {offsets = [0, 32], sizes = [2, 32], strides = [1, 1]} : vector<2x128xf32> to vector<2x32xf32>
    %81 = vector.extract_strided_slice %78 {offsets = [0, 64], sizes = [2, 32], strides = [1, 1]} : vector<2x128xf32> to vector<2x32xf32>
    %82 = vector.extract_strided_slice %77 {offsets = [0, 96], sizes = [2, 32], strides = [1, 1]} : vector<2x128xf32> to vector<2x32xf32>
    %83 = arith.mulf %80, %66 : vector<2x32xf32>
    %84 = arith.mulf %79, %81 : vector<2x32xf32>
    %85 = arith.addf %83, %84 : vector<2x32xf32>
    %86 = math.tanh %85 : vector<2x32xf32>
    %87 = arith.mulf %82, %86 : vector<2x32xf32>
    %c6 = arith.constant 6 : index
    %c0_25 = arith.constant 0 : index
    %88 = vector.load %arg15[%c6, %c0_25] : memref<16x32xf32, #tpu.memory_space<vmem>>, vector<2x32xf32>
    tpu.vector_store %arg15[%c6, %c0_25], %87 {strides = array<i32>} : memref<16x32xf32, #tpu.memory_space<vmem>>, vector<2x32xf32>,
    %89 = vector.extract_strided_slice %9 {offsets = [8, 0], sizes = [2, 128], strides = [1, 1]} : vector<16x128xf32> to vector<2x128xf32>
    %cst_26 = arith.constant dense<0.000000e+00> : vector<2x128xf32>
    %90 = tpu.matmul %87, %10, %cst_26 {dimension_numbers = #tpu.dot_dimension_numbers<[1], [0], [0], [1], [0, 0, 1, 1], [], []>} : vector<2x32xf32>, vector<32x128xf32>, vector<2x128xf32> -> vector<2x128xf32>
    %91 = arith.addf %89, %90 : vector<2x128xf32>
    %92 = arith.negf %91 : vector<2x128xf32>
    %93 = math.exp %92 : vector<2x128xf32>
    %cst_27 = arith.constant 1.000000e+00 : f32
    %94 = vector.broadcast %cst_27 : f32 to vector<2x128xf32>
    %95 = arith.addf %94, %93 : vector<2x128xf32>
    %96 = arith.divf %94, %95 : vector<2x128xf32>
    %97 = math.tanh %91 : vector<2x128xf32>
    %98 = vector.extract_strided_slice %96 {offsets = [0, 0], sizes = [2, 32], strides = [1, 1]} : vector<2x128xf32> to vector<2x32xf32>
    %99 = vector.extract_strided_slice %96 {offsets = [0, 32], sizes = [2, 32], strides = [1, 1]} : vector<2x128xf32> to vector<2x32xf32>
    %100 = vector.extract_strided_slice %97 {offsets = [0, 64], sizes = [2, 32], strides = [1, 1]} : vector<2x128xf32> to vector<2x32xf32>
    %101 = vector.extract_strided_slice %96 {offsets = [0, 96], sizes = [2, 32], strides = [1, 1]} : vector<2x128xf32> to vector<2x32xf32>
    %102 = arith.mulf %99, %85 : vector<2x32xf32>
    %103 = arith.mulf %98, %100 : vector<2x32xf32>
    %104 = arith.addf %102, %103 : vector<2x32xf32>
    %105 = math.tanh %104 : vector<2x32xf32>
    %106 = arith.mulf %101, %105 : vector<2x32xf32>
    %c8 = arith.constant 8 : index
    %c0_28 = arith.constant 0 : index
    %107 = vector.load %arg15[%c8, %c0_28] : memref<16x32xf32, #tpu.memory_space<vmem>>, vector<2x32xf32>
    tpu.vector_store %arg15[%c8, %c0_28], %106 {strides = array<i32>} : memref<16x32xf32, #tpu.memory_space<vmem>>, vector<2x32xf32>,
    %108 = vector.extract_strided_slice %9 {offsets = [10, 0], sizes = [2, 128], strides = [1, 1]} : vector<16x128xf32> to vector<2x128xf32>
    %cst_29 = arith.constant dense<0.000000e+00> : vector<2x128xf32>
    %109 = tpu.matmul %106, %10, %cst_29 {dimension_numbers = #tpu.dot_dimension_numbers<[1], [0], [0], [1], [0, 0, 1, 1], [], []>} : vector<2x32xf32>, vector<32x128xf32>, vector<2x128xf32> -> vector<2x128xf32>
    %110 = arith.addf %108, %109 : vector<2x128xf32>
    %111 = arith.negf %110 : vector<2x128xf32>
    %112 = math.exp %111 : vector<2x128xf32>
    %cst_30 = arith.constant 1.000000e+00 : f32
    %113 = vector.broadcast %cst_30 : f32 to vector<2x128xf32>
    %114 = arith.addf %113, %112 : vector<2x128xf32>
    %115 = arith.divf %113, %114 : vector<2x128xf32>
    %116 = math.tanh %110 : vector<2x128xf32>
    %117 = vector.extract_strided_slice %115 {offsets = [0, 0], sizes = [2, 32], strides = [1, 1]} : vector<2x128xf32> to vector<2x32xf32>
    %118 = vector.extract_strided_slice %115 {offsets = [0, 32], sizes = [2, 32], strides = [1, 1]} : vector<2x128xf32> to vector<2x32xf32>
    %119 = vector.extract_strided_slice %116 {offsets = [0, 64], sizes = [2, 32], strides = [1, 1]} : vector<2x128xf32> to vector<2x32xf32>
    %120 = vector.extract_strided_slice %115 {offsets = [0, 96], sizes = [2, 32], strides = [1, 1]} : vector<2x128xf32> to vector<2x32xf32>
    %121 = arith.mulf %118, %104 : vector<2x32xf32>
    %122 = arith.mulf %117, %119 : vector<2x32xf32>
    %123 = arith.addf %121, %122 : vector<2x32xf32>
    %124 = math.tanh %123 : vector<2x32xf32>
    %125 = arith.mulf %120, %124 : vector<2x32xf32>
    %c10 = arith.constant 10 : index
    %c0_31 = arith.constant 0 : index
    %126 = vector.load %arg15[%c10, %c0_31] : memref<16x32xf32, #tpu.memory_space<vmem>>, vector<2x32xf32>
    tpu.vector_store %arg15[%c10, %c0_31], %125 {strides = array<i32>} : memref<16x32xf32, #tpu.memory_space<vmem>>, vector<2x32xf32>,
    %127 = vector.extract_strided_slice %9 {offsets = [12, 0], sizes = [2, 128], strides = [1, 1]} : vector<16x128xf32> to vector<2x128xf32>
    %cst_32 = arith.constant dense<0.000000e+00> : vector<2x128xf32>
    %128 = tpu.matmul %125, %10, %cst_32 {dimension_numbers = #tpu.dot_dimension_numbers<[1], [0], [0], [1], [0, 0, 1, 1], [], []>} : vector<2x32xf32>, vector<32x128xf32>, vector<2x128xf32> -> vector<2x128xf32>
    %129 = arith.addf %127, %128 : vector<2x128xf32>
    %130 = arith.negf %129 : vector<2x128xf32>
    %131 = math.exp %130 : vector<2x128xf32>
    %cst_33 = arith.constant 1.000000e+00 : f32
    %132 = vector.broadcast %cst_33 : f32 to vector<2x128xf32>
    %133 = arith.addf %132, %131 : vector<2x128xf32>
    %134 = arith.divf %132, %133 : vector<2x128xf32>
    %135 = math.tanh %129 : vector<2x128xf32>
    %136 = vector.extract_strided_slice %134 {offsets = [0, 0], sizes = [2, 32], strides = [1, 1]} : vector<2x128xf32> to vector<2x32xf32>
    %137 = vector.extract_strided_slice %134 {offsets = [0, 32], sizes = [2, 32], strides = [1, 1]} : vector<2x128xf32> to vector<2x32xf32>
    %138 = vector.extract_strided_slice %135 {offsets = [0, 64], sizes = [2, 32], strides = [1, 1]} : vector<2x128xf32> to vector<2x32xf32>
    %139 = vector.extract_strided_slice %134 {offsets = [0, 96], sizes = [2, 32], strides = [1, 1]} : vector<2x128xf32> to vector<2x32xf32>
    %140 = arith.mulf %137, %123 : vector<2x32xf32>
    %141 = arith.mulf %136, %138 : vector<2x32xf32>
    %142 = arith.addf %140, %141 : vector<2x32xf32>
    %143 = math.tanh %142 : vector<2x32xf32>
    %144 = arith.mulf %139, %143 : vector<2x32xf32>
    %c12 = arith.constant 12 : index
    %c0_34 = arith.constant 0 : index
    %145 = vector.load %arg15[%c12, %c0_34] : memref<16x32xf32, #tpu.memory_space<vmem>>, vector<2x32xf32>
    tpu.vector_store %arg15[%c12, %c0_34], %144 {strides = array<i32>} : memref<16x32xf32, #tpu.memory_space<vmem>>, vector<2x32xf32>,
    %146 = vector.extract_strided_slice %9 {offsets = [14, 0], sizes = [2, 128], strides = [1, 1]} : vector<16x128xf32> to vector<2x128xf32>
    %cst_35 = arith.constant dense<0.000000e+00> : vector<2x128xf32>
    %147 = tpu.matmul %144, %10, %cst_35 {dimension_numbers = #tpu.dot_dimension_numbers<[1], [0], [0], [1], [0, 0, 1, 1], [], []>} : vector<2x32xf32>, vector<32x128xf32>, vector<2x128xf32> -> vector<2x128xf32>
    %148 = arith.addf %146, %147 : vector<2x128xf32>
    %149 = arith.negf %148 : vector<2x128xf32>
    %150 = math.exp %149 : vector<2x128xf32>
    %cst_36 = arith.constant 1.000000e+00 : f32
    %151 = vector.broadcast %cst_36 : f32 to vector<2x128xf32>
    %152 = arith.addf %151, %150 : vector<2x128xf32>
    %153 = arith.divf %151, %152 : vector<2x128xf32>
    %154 = math.tanh %148 : vector<2x128xf32>
    %155 = vector.extract_strided_slice %153 {offsets = [0, 0], sizes = [2, 32], strides = [1, 1]} : vector<2x128xf32> to vector<2x32xf32>
    %156 = vector.extract_strided_slice %153 {offsets = [0, 32], sizes = [2, 32], strides = [1, 1]} : vector<2x128xf32> to vector<2x32xf32>
    %157 = vector.extract_strided_slice %154 {offsets = [0, 64], sizes = [2, 32], strides = [1, 1]} : vector<2x128xf32> to vector<2x32xf32>
    %158 = vector.extract_strided_slice %153 {offsets = [0, 96], sizes = [2, 32], strides = [1, 1]} : vector<2x128xf32> to vector<2x32xf32>
    %159 = arith.mulf %156, %142 : vector<2x32xf32>
    %160 = arith.mulf %155, %157 : vector<2x32xf32>
    %161 = arith.addf %159, %160 : vector<2x32xf32>
    %162 = math.tanh %161 : vector<2x32xf32>
    %163 = arith.mulf %158, %162 : vector<2x32xf32>
    %c14 = arith.constant 14 : index
    %c0_37 = arith.constant 0 : index
    %164 = vector.load %arg15[%c14, %c0_37] : memref<16x32xf32, #tpu.memory_space<vmem>>, vector<2x32xf32>
    tpu.vector_store %arg15[%c14, %c0_37], %163 {strides = array<i32>} : memref<16x32xf32, #tpu.memory_space<vmem>>, vector<2x32xf32>,
    %c0_38 = arith.constant 0 : index
    %c0_39 = arith.constant 0 : index
    %165 = vector.load %arg11[%c0_38, %c0_39] : memref<2x32xf32, #tpu.memory_space<vmem>>, vector<2x32xf32>
    tpu.vector_store %arg11[%c0_38, %c0_39], %163 {strides = array<i32>} : memref<2x32xf32, #tpu.memory_space<vmem>>, vector<2x32xf32>,
    %c0_40 = arith.constant 0 : index
    %c0_41 = arith.constant 0 : index
    %166 = vector.load %arg12[%c0_40, %c0_41] : memref<2x32xf32, #tpu.memory_space<vmem>>, vector<2x32xf32>
    tpu.vector_store %arg12[%c0_40, %c0_41], %161 {strides = array<i32>} : memref<2x32xf32, #tpu.memory_space<vmem>>, vector<2x32xf32>,
    %c0_42 = arith.constant 0 : index
    %c0_43 = arith.constant 0 : index
    %167 = vector.load %arg15[%c0_42, %c0_43] : memref<16x32xf32, #tpu.memory_space<vmem>>, vector<16x32xf32>
    %c0_44 = arith.constant 0 : index
    %c0_45 = arith.constant 0 : index
    %168 = vector.load %arg5[%c0_44, %c0_45] : memref<32x128xf32, #tpu.memory_space<vmem>>, vector<32x128xf32>
    %cst_46 = arith.constant dense<0.000000e+00> : vector<16x128xf32>
    %169 = tpu.matmul %167, %168, %cst_46 {dimension_numbers = #tpu.dot_dimension_numbers<[1], [0], [0], [1], [0, 0, 1, 1], [], []>} : vector<16x32xf32>, vector<32x128xf32>, vector<16x128xf32> -> vector<16x128xf32>
    %c0_47 = arith.constant 0 : index
    %c0_48 = arith.constant 0 : index
    %170 = vector.load %arg6[%c0_47, %c0_48] : memref<1x128xf32, #tpu.memory_space<vmem>>, vector<1x128xf32>
    %171 = vector.broadcast %170 : vector<1x128xf32> to vector<16x128xf32>
    %172 = arith.addf %169, %171 : vector<16x128xf32>
    %c0_49 = arith.constant 0 : index
    %c0_50 = arith.constant 0 : index
    %173 = vector.load %arg7[%c0_49, %c0_50] : memref<32x128xf32, #tpu.memory_space<vmem>>, vector<32x128xf32>
    %c0_51 = arith.constant 0 : index
    %c0_52 = arith.constant 0 : index
    %174 = vector.load %arg13[%c0_51, %c0_52] : memref<2x32xf32, #tpu.memory_space<vmem>>, vector<2x32xf32>
    %c0_53 = arith.constant 0 : index
    %c0_54 = arith.constant 0 : index
    %175 = vector.load %arg14[%c0_53, %c0_54] : memref<2x32xf32, #tpu.memory_space<vmem>>, vector<2x32xf32>
    %176 = vector.extract_strided_slice %172 {offsets = [0, 0], sizes = [2, 128], strides = [1, 1]} : vector<16x128xf32> to vector<2x128xf32>
    %cst_55 = arith.constant dense<0.000000e+00> : vector<2x128xf32>
    %177 = tpu.matmul %174, %173, %cst_55 {dimension_numbers = #tpu.dot_dimension_numbers<[1], [0], [0], [1], [0, 0, 1, 1], [], []>} : vector<2x32xf32>, vector<32x128xf32>, vector<2x128xf32> -> vector<2x128xf32>
    %178 = arith.addf %176, %177 : vector<2x128xf32>
    %179 = arith.negf %178 : vector<2x128xf32>
    %180 = math.exp %179 : vector<2x128xf32>
    %cst_56 = arith.constant 1.000000e+00 : f32
    %181 = vector.broadcast %cst_56 : f32 to vector<2x128xf32>
    %182 = arith.addf %181, %180 : vector<2x128xf32>
    %183 = arith.divf %181, %182 : vector<2x128xf32>
    %184 = math.tanh %178 : vector<2x128xf32>
    %185 = vector.extract_strided_slice %183 {offsets = [0, 0], sizes = [2, 32], strides = [1, 1]} : vector<2x128xf32> to vector<2x32xf32>
    %186 = vector.extract_strided_slice %183 {offsets = [0, 32], sizes = [2, 32], strides = [1, 1]} : vector<2x128xf32> to vector<2x32xf32>
    %187 = vector.extract_strided_slice %184 {offsets = [0, 64], sizes = [2, 32], strides = [1, 1]} : vector<2x128xf32> to vector<2x32xf32>
    %188 = vector.extract_strided_slice %183 {offsets = [0, 96], sizes = [2, 32], strides = [1, 1]} : vector<2x128xf32> to vector<2x32xf32>
    %189 = arith.mulf %186, %175 : vector<2x32xf32>
    %190 = arith.mulf %185, %187 : vector<2x32xf32>
    %191 = arith.addf %189, %190 : vector<2x32xf32>
    %192 = math.tanh %191 : vector<2x32xf32>
    %193 = arith.mulf %188, %192 : vector<2x32xf32>
    %c0_57 = arith.constant 0 : index
    %c0_58 = arith.constant 0 : index
    %194 = vector.load %arg15[%c0_57, %c0_58] : memref<16x32xf32, #tpu.memory_space<vmem>>, vector<2x32xf32>
    tpu.vector_store %arg15[%c0_57, %c0_58], %193 {strides = array<i32>} : memref<16x32xf32, #tpu.memory_space<vmem>>, vector<2x32xf32>,
    %195 = vector.extract_strided_slice %172 {offsets = [2, 0], sizes = [2, 128], strides = [1, 1]} : vector<16x128xf32> to vector<2x128xf32>
    %cst_59 = arith.constant dense<0.000000e+00> : vector<2x128xf32>
    %196 = tpu.matmul %193, %173, %cst_59 {dimension_numbers = #tpu.dot_dimension_numbers<[1], [0], [0], [1], [0, 0, 1, 1], [], []>} : vector<2x32xf32>, vector<32x128xf32>, vector<2x128xf32> -> vector<2x128xf32>
    %197 = arith.addf %195, %196 : vector<2x128xf32>
    %198 = arith.negf %197 : vector<2x128xf32>
    %199 = math.exp %198 : vector<2x128xf32>
    %cst_60 = arith.constant 1.000000e+00 : f32
    %200 = vector.broadcast %cst_60 : f32 to vector<2x128xf32>
    %201 = arith.addf %200, %199 : vector<2x128xf32>
    %202 = arith.divf %200, %201 : vector<2x128xf32>
    %203 = math.tanh %197 : vector<2x128xf32>
    %204 = vector.extract_strided_slice %202 {offsets = [0, 0], sizes = [2, 32], strides = [1, 1]} : vector<2x128xf32> to vector<2x32xf32>
    %205 = vector.extract_strided_slice %202 {offsets = [0, 32], sizes = [2, 32], strides = [1, 1]} : vector<2x128xf32> to vector<2x32xf32>
    %206 = vector.extract_strided_slice %203 {offsets = [0, 64], sizes = [2, 32], strides = [1, 1]} : vector<2x128xf32> to vector<2x32xf32>
    %207 = vector.extract_strided_slice %202 {offsets = [0, 96], sizes = [2, 32], strides = [1, 1]} : vector<2x128xf32> to vector<2x32xf32>
    %208 = arith.mulf %205, %191 : vector<2x32xf32>
    %209 = arith.mulf %204, %206 : vector<2x32xf32>
    %210 = arith.addf %208, %209 : vector<2x32xf32>
    %211 = math.tanh %210 : vector<2x32xf32>
    %212 = arith.mulf %207, %211 : vector<2x32xf32>
    %c2_61 = arith.constant 2 : index
    %c0_62 = arith.constant 0 : index
    %213 = vector.load %arg15[%c2_61, %c0_62] : memref<16x32xf32, #tpu.memory_space<vmem>>, vector<2x32xf32>
    tpu.vector_store %arg15[%c2_61, %c0_62], %212 {strides = array<i32>} : memref<16x32xf32, #tpu.memory_space<vmem>>, vector<2x32xf32>,
    %214 = vector.extract_strided_slice %172 {offsets = [4, 0], sizes = [2, 128], strides = [1, 1]} : vector<16x128xf32> to vector<2x128xf32>
    %cst_63 = arith.constant dense<0.000000e+00> : vector<2x128xf32>
    %215 = tpu.matmul %212, %173, %cst_63 {dimension_numbers = #tpu.dot_dimension_numbers<[1], [0], [0], [1], [0, 0, 1, 1], [], []>} : vector<2x32xf32>, vector<32x128xf32>, vector<2x128xf32> -> vector<2x128xf32>
    %216 = arith.addf %214, %215 : vector<2x128xf32>
    %217 = arith.negf %216 : vector<2x128xf32>
    %218 = math.exp %217 : vector<2x128xf32>
    %cst_64 = arith.constant 1.000000e+00 : f32
    %219 = vector.broadcast %cst_64 : f32 to vector<2x128xf32>
    %220 = arith.addf %219, %218 : vector<2x128xf32>
    %221 = arith.divf %219, %220 : vector<2x128xf32>
    %222 = math.tanh %216 : vector<2x128xf32>
    %223 = vector.extract_strided_slice %221 {offsets = [0, 0], sizes = [2, 32], strides = [1, 1]} : vector<2x128xf32> to vector<2x32xf32>
    %224 = vector.extract_strided_slice %221 {offsets = [0, 32], sizes = [2, 32], strides = [1, 1]} : vector<2x128xf32> to vector<2x32xf32>
    %225 = vector.extract_strided_slice %222 {offsets = [0, 64], sizes = [2, 32], strides = [1, 1]} : vector<2x128xf32> to vector<2x32xf32>
    %226 = vector.extract_strided_slice %221 {offsets = [0, 96], sizes = [2, 32], strides = [1, 1]} : vector<2x128xf32> to vector<2x32xf32>
    %227 = arith.mulf %224, %210 : vector<2x32xf32>
    %228 = arith.mulf %223, %225 : vector<2x32xf32>
    %229 = arith.addf %227, %228 : vector<2x32xf32>
    %230 = math.tanh %229 : vector<2x32xf32>
    %231 = arith.mulf %226, %230 : vector<2x32xf32>
    %c4_65 = arith.constant 4 : index
    %c0_66 = arith.constant 0 : index
    %232 = vector.load %arg15[%c4_65, %c0_66] : memref<16x32xf32, #tpu.memory_space<vmem>>, vector<2x32xf32>
    tpu.vector_store %arg15[%c4_65, %c0_66], %231 {strides = array<i32>} : memref<16x32xf32, #tpu.memory_space<vmem>>, vector<2x32xf32>,
    %233 = vector.extract_strided_slice %172 {offsets = [6, 0], sizes = [2, 128], strides = [1, 1]} : vector<16x128xf32> to vector<2x128xf32>
    %cst_67 = arith.constant dense<0.000000e+00> : vector<2x128xf32>
    %234 = tpu.matmul %231, %173, %cst_67 {dimension_numbers = #tpu.dot_dimension_numbers<[1], [0], [0], [1], [0, 0, 1, 1], [], []>} : vector<2x32xf32>, vector<32x128xf32>, vector<2x128xf32> -> vector<2x128xf32>
    %235 = arith.addf %233, %234 : vector<2x128xf32>
    %236 = arith.negf %235 : vector<2x128xf32>
    %237 = math.exp %236 : vector<2x128xf32>
    %cst_68 = arith.constant 1.000000e+00 : f32
    %238 = vector.broadcast %cst_68 : f32 to vector<2x128xf32>
    %239 = arith.addf %238, %237 : vector<2x128xf32>
    %240 = arith.divf %238, %239 : vector<2x128xf32>
    %241 = math.tanh %235 : vector<2x128xf32>
    %242 = vector.extract_strided_slice %240 {offsets = [0, 0], sizes = [2, 32], strides = [1, 1]} : vector<2x128xf32> to vector<2x32xf32>
    %243 = vector.extract_strided_slice %240 {offsets = [0, 32], sizes = [2, 32], strides = [1, 1]} : vector<2x128xf32> to vector<2x32xf32>
    %244 = vector.extract_strided_slice %241 {offsets = [0, 64], sizes = [2, 32], strides = [1, 1]} : vector<2x128xf32> to vector<2x32xf32>
    %245 = vector.extract_strided_slice %240 {offsets = [0, 96], sizes = [2, 32], strides = [1, 1]} : vector<2x128xf32> to vector<2x32xf32>
    %246 = arith.mulf %243, %229 : vector<2x32xf32>
    %247 = arith.mulf %242, %244 : vector<2x32xf32>
    %248 = arith.addf %246, %247 : vector<2x32xf32>
    %249 = math.tanh %248 : vector<2x32xf32>
    %250 = arith.mulf %245, %249 : vector<2x32xf32>
    %c6_69 = arith.constant 6 : index
    %c0_70 = arith.constant 0 : index
    %251 = vector.load %arg15[%c6_69, %c0_70] : memref<16x32xf32, #tpu.memory_space<vmem>>, vector<2x32xf32>
    tpu.vector_store %arg15[%c6_69, %c0_70], %250 {strides = array<i32>} : memref<16x32xf32, #tpu.memory_space<vmem>>, vector<2x32xf32>,
    %252 = vector.extract_strided_slice %172 {offsets = [8, 0], sizes = [2, 128], strides = [1, 1]} : vector<16x128xf32> to vector<2x128xf32>
    %cst_71 = arith.constant dense<0.000000e+00> : vector<2x128xf32>
    %253 = tpu.matmul %250, %173, %cst_71 {dimension_numbers = #tpu.dot_dimension_numbers<[1], [0], [0], [1], [0, 0, 1, 1], [], []>} : vector<2x32xf32>, vector<32x128xf32>, vector<2x128xf32> -> vector<2x128xf32>
    %254 = arith.addf %252, %253 : vector<2x128xf32>
    %255 = arith.negf %254 : vector<2x128xf32>
    %256 = math.exp %255 : vector<2x128xf32>
    %cst_72 = arith.constant 1.000000e+00 : f32
    %257 = vector.broadcast %cst_72 : f32 to vector<2x128xf32>
    %258 = arith.addf %257, %256 : vector<2x128xf32>
    %259 = arith.divf %257, %258 : vector<2x128xf32>
    %260 = math.tanh %254 : vector<2x128xf32>
    %261 = vector.extract_strided_slice %259 {offsets = [0, 0], sizes = [2, 32], strides = [1, 1]} : vector<2x128xf32> to vector<2x32xf32>
    %262 = vector.extract_strided_slice %259 {offsets = [0, 32], sizes = [2, 32], strides = [1, 1]} : vector<2x128xf32> to vector<2x32xf32>
    %263 = vector.extract_strided_slice %260 {offsets = [0, 64], sizes = [2, 32], strides = [1, 1]} : vector<2x128xf32> to vector<2x32xf32>
    %264 = vector.extract_strided_slice %259 {offsets = [0, 96], sizes = [2, 32], strides = [1, 1]} : vector<2x128xf32> to vector<2x32xf32>
    %265 = arith.mulf %262, %248 : vector<2x32xf32>
    %266 = arith.mulf %261, %263 : vector<2x32xf32>
    %267 = arith.addf %265, %266 : vector<2x32xf32>
    %268 = math.tanh %267 : vector<2x32xf32>
    %269 = arith.mulf %264, %268 : vector<2x32xf32>
    %c8_73 = arith.constant 8 : index
    %c0_74 = arith.constant 0 : index
    %270 = vector.load %arg15[%c8_73, %c0_74] : memref<16x32xf32, #tpu.memory_space<vmem>>, vector<2x32xf32>
    tpu.vector_store %arg15[%c8_73, %c0_74], %269 {strides = array<i32>} : memref<16x32xf32, #tpu.memory_space<vmem>>, vector<2x32xf32>,
    %271 = vector.extract_strided_slice %172 {offsets = [10, 0], sizes = [2, 128], strides = [1, 1]} : vector<16x128xf32> to vector<2x128xf32>
    %cst_75 = arith.constant dense<0.000000e+00> : vector<2x128xf32>
    %272 = tpu.matmul %269, %173, %cst_75 {dimension_numbers = #tpu.dot_dimension_numbers<[1], [0], [0], [1], [0, 0, 1, 1], [], []>} : vector<2x32xf32>, vector<32x128xf32>, vector<2x128xf32> -> vector<2x128xf32>
    %273 = arith.addf %271, %272 : vector<2x128xf32>
    %274 = arith.negf %273 : vector<2x128xf32>
    %275 = math.exp %274 : vector<2x128xf32>
    %cst_76 = arith.constant 1.000000e+00 : f32
    %276 = vector.broadcast %cst_76 : f32 to vector<2x128xf32>
    %277 = arith.addf %276, %275 : vector<2x128xf32>
    %278 = arith.divf %276, %277 : vector<2x128xf32>
    %279 = math.tanh %273 : vector<2x128xf32>
    %280 = vector.extract_strided_slice %278 {offsets = [0, 0], sizes = [2, 32], strides = [1, 1]} : vector<2x128xf32> to vector<2x32xf32>
    %281 = vector.extract_strided_slice %278 {offsets = [0, 32], sizes = [2, 32], strides = [1, 1]} : vector<2x128xf32> to vector<2x32xf32>
    %282 = vector.extract_strided_slice %279 {offsets = [0, 64], sizes = [2, 32], strides = [1, 1]} : vector<2x128xf32> to vector<2x32xf32>
    %283 = vector.extract_strided_slice %278 {offsets = [0, 96], sizes = [2, 32], strides = [1, 1]} : vector<2x128xf32> to vector<2x32xf32>
    %284 = arith.mulf %281, %267 : vector<2x32xf32>
    %285 = arith.mulf %280, %282 : vector<2x32xf32>
    %286 = arith.addf %284, %285 : vector<2x32xf32>
    %287 = math.tanh %286 : vector<2x32xf32>
    %288 = arith.mulf %283, %287 : vector<2x32xf32>
    %c10_77 = arith.constant 10 : index
    %c0_78 = arith.constant 0 : index
    %289 = vector.load %arg15[%c10_77, %c0_78] : memref<16x32xf32, #tpu.memory_space<vmem>>, vector<2x32xf32>
    tpu.vector_store %arg15[%c10_77, %c0_78], %288 {strides = array<i32>} : memref<16x32xf32, #tpu.memory_space<vmem>>, vector<2x32xf32>,
    %290 = vector.extract_strided_slice %172 {offsets = [12, 0], sizes = [2, 128], strides = [1, 1]} : vector<16x128xf32> to vector<2x128xf32>
    %cst_79 = arith.constant dense<0.000000e+00> : vector<2x128xf32>
    %291 = tpu.matmul %288, %173, %cst_79 {dimension_numbers = #tpu.dot_dimension_numbers<[1], [0], [0], [1], [0, 0, 1, 1], [], []>} : vector<2x32xf32>, vector<32x128xf32>, vector<2x128xf32> -> vector<2x128xf32>
    %292 = arith.addf %290, %291 : vector<2x128xf32>
    %293 = arith.negf %292 : vector<2x128xf32>
    %294 = math.exp %293 : vector<2x128xf32>
    %cst_80 = arith.constant 1.000000e+00 : f32
    %295 = vector.broadcast %cst_80 : f32 to vector<2x128xf32>
    %296 = arith.addf %295, %294 : vector<2x128xf32>
    %297 = arith.divf %295, %296 : vector<2x128xf32>
    %298 = math.tanh %292 : vector<2x128xf32>
    %299 = vector.extract_strided_slice %297 {offsets = [0, 0], sizes = [2, 32], strides = [1, 1]} : vector<2x128xf32> to vector<2x32xf32>
    %300 = vector.extract_strided_slice %297 {offsets = [0, 32], sizes = [2, 32], strides = [1, 1]} : vector<2x128xf32> to vector<2x32xf32>
    %301 = vector.extract_strided_slice %298 {offsets = [0, 64], sizes = [2, 32], strides = [1, 1]} : vector<2x128xf32> to vector<2x32xf32>
    %302 = vector.extract_strided_slice %297 {offsets = [0, 96], sizes = [2, 32], strides = [1, 1]} : vector<2x128xf32> to vector<2x32xf32>
    %303 = arith.mulf %300, %286 : vector<2x32xf32>
    %304 = arith.mulf %299, %301 : vector<2x32xf32>
    %305 = arith.addf %303, %304 : vector<2x32xf32>
    %306 = math.tanh %305 : vector<2x32xf32>
    %307 = arith.mulf %302, %306 : vector<2x32xf32>
    %c12_81 = arith.constant 12 : index
    %c0_82 = arith.constant 0 : index
    %308 = vector.load %arg15[%c12_81, %c0_82] : memref<16x32xf32, #tpu.memory_space<vmem>>, vector<2x32xf32>
    tpu.vector_store %arg15[%c12_81, %c0_82], %307 {strides = array<i32>} : memref<16x32xf32, #tpu.memory_space<vmem>>, vector<2x32xf32>,
    %309 = vector.extract_strided_slice %172 {offsets = [14, 0], sizes = [2, 128], strides = [1, 1]} : vector<16x128xf32> to vector<2x128xf32>
    %cst_83 = arith.constant dense<0.000000e+00> : vector<2x128xf32>
    %310 = tpu.matmul %307, %173, %cst_83 {dimension_numbers = #tpu.dot_dimension_numbers<[1], [0], [0], [1], [0, 0, 1, 1], [], []>} : vector<2x32xf32>, vector<32x128xf32>, vector<2x128xf32> -> vector<2x128xf32>
    %311 = arith.addf %309, %310 : vector<2x128xf32>
    %312 = arith.negf %311 : vector<2x128xf32>
    %313 = math.exp %312 : vector<2x128xf32>
    %cst_84 = arith.constant 1.000000e+00 : f32
    %314 = vector.broadcast %cst_84 : f32 to vector<2x128xf32>
    %315 = arith.addf %314, %313 : vector<2x128xf32>
    %316 = arith.divf %314, %315 : vector<2x128xf32>
    %317 = math.tanh %311 : vector<2x128xf32>
    %318 = vector.extract_strided_slice %316 {offsets = [0, 0], sizes = [2, 32], strides = [1, 1]} : vector<2x128xf32> to vector<2x32xf32>
    %319 = vector.extract_strided_slice %316 {offsets = [0, 32], sizes = [2, 32], strides = [1, 1]} : vector<2x128xf32> to vector<2x32xf32>
    %320 = vector.extract_strided_slice %317 {offsets = [0, 64], sizes = [2, 32], strides = [1, 1]} : vector<2x128xf32> to vector<2x32xf32>
    %321 = vector.extract_strided_slice %316 {offsets = [0, 96], sizes = [2, 32], strides = [1, 1]} : vector<2x128xf32> to vector<2x32xf32>
    %322 = arith.mulf %319, %305 : vector<2x32xf32>
    %323 = arith.mulf %318, %320 : vector<2x32xf32>
    %324 = arith.addf %322, %323 : vector<2x32xf32>
    %325 = math.tanh %324 : vector<2x32xf32>
    %326 = arith.mulf %321, %325 : vector<2x32xf32>
    %c14_85 = arith.constant 14 : index
    %c0_86 = arith.constant 0 : index
    %327 = vector.load %arg15[%c14_85, %c0_86] : memref<16x32xf32, #tpu.memory_space<vmem>>, vector<2x32xf32>
    tpu.vector_store %arg15[%c14_85, %c0_86], %326 {strides = array<i32>} : memref<16x32xf32, #tpu.memory_space<vmem>>, vector<2x32xf32>,
    %c0_87 = arith.constant 0 : index
    %c0_88 = arith.constant 0 : index
    %328 = vector.load %arg13[%c0_87, %c0_88] : memref<2x32xf32, #tpu.memory_space<vmem>>, vector<2x32xf32>
    tpu.vector_store %arg13[%c0_87, %c0_88], %326 {strides = array<i32>} : memref<2x32xf32, #tpu.memory_space<vmem>>, vector<2x32xf32>,
    %c0_89 = arith.constant 0 : index
    %c0_90 = arith.constant 0 : index
    %329 = vector.load %arg14[%c0_89, %c0_90] : memref<2x32xf32, #tpu.memory_space<vmem>>, vector<2x32xf32>
    tpu.vector_store %arg14[%c0_89, %c0_90], %324 {strides = array<i32>} : memref<2x32xf32, #tpu.memory_space<vmem>>, vector<2x32xf32>,
    %c0_91 = arith.constant 0 : index
    %c0_92 = arith.constant 0 : index
    %330 = vector.load %arg15[%c0_91, %c0_92] : memref<16x32xf32, #tpu.memory_space<vmem>>, vector<16x32xf32>
    %c0_93 = arith.constant 0 : index
    %c0_94 = arith.constant 0 : index
    %331 = vector.load %arg8[%c0_93, %c0_94] : memref<1x32xf32, #tpu.memory_space<vmem>>, vector<1x32xf32>
    %332 = vector.broadcast %331 : vector<1x32xf32> to vector<16x32xf32>
    %333 = arith.mulf %330, %332 : vector<16x32xf32>
    %cst_95 = arith.constant dense<0.000000e+00> : vector<16xf32>
    %334 = vector.multi_reduction <add>, %333, %cst_95 [1] : vector<16x32xf32> to vector<16xf32>
    %335 = vector.shape_cast %334 : vector<16xf32> to vector<16x1xf32>
    %c0_96 = arith.constant 0 : index
    %c0_97 = arith.constant 0 : index
    %336 = vector.load %arg9[%c0_96, %c0_97] : memref<1x1xf32, #tpu.memory_space<vmem>>, vector<1x1xf32>
    %337 = vector.broadcast %336 : vector<1x1xf32> to vector<16x1xf32>
    %338 = arith.addf %335, %337 : vector<16x1xf32>
    %c0_98 = arith.constant 0 : index
    %c0_99 = arith.constant 0 : index
    %c0_100 = arith.constant 0 : index
    %339 = vector.load %arg10[%c0_98, %c0_99, %c0_100] : memref<1x16x1xf32, #tpu.memory_space<vmem>>, vector<1x16x1xf32>
    %340 = vector.shape_cast %339 : vector<1x16x1xf32> to vector<16x1xf32>
    %341 = vector.shape_cast %338 : vector<16x1xf32> to vector<1x16x1xf32>
    tpu.vector_store %arg10[%c0_98, %c0_99, %c0_100], %341 {strides = array<i32>} : memref<1x16x1xf32, #tpu.memory_space<vmem>>, vector<1x16x1xf32>,
    return
  }
  func.func @transform_0(%arg0: i32) -> (i32, i32, i32) {
    %c0_i32 = arith.constant 0 : i32
    %c0_i32_0 = arith.constant 0 : i32
    %c0_i32_1 = arith.constant 0 : i32
    return %arg0, %c0_i32, %c0_i32_0 : i32, i32, i32
  }
  func.func @transform_1(%arg0: i32) -> (i32, i32) {
    %c0_i32 = arith.constant 0 : i32
    %c0_i32_0 = arith.constant 0 : i32
    %c0_i32_1 = arith.constant 0 : i32
    return %c0_i32, %c0_i32_0 : i32, i32
  }
  func.func @transform_2(%arg0: i32) -> (i32, i32) {
    %c0_i32 = arith.constant 0 : i32
    %c0_i32_0 = arith.constant 0 : i32
    %c0_i32_1 = arith.constant 0 : i32
    return %c0_i32, %c0_i32_0 : i32, i32
  }
  func.func @transform_3(%arg0: i32) -> (i32, i32) {
    %c0_i32 = arith.constant 0 : i32
    %c0_i32_0 = arith.constant 0 : i32
    %c0_i32_1 = arith.constant 0 : i32
    return %c0_i32, %c0_i32_0 : i32, i32
  }
  func.func @transform_4(%arg0: i32) -> (i32, i32) {
    %c0_i32 = arith.constant 0 : i32
    %c0_i32_0 = arith.constant 0 : i32
    %c0_i32_1 = arith.constant 0 : i32
    return %c0_i32, %c0_i32_0 : i32, i32
  }
  func.func @transform_5(%arg0: i32) -> (i32, i32) {
    %c0_i32 = arith.constant 0 : i32
    %c0_i32_0 = arith.constant 0 : i32
    %c0_i32_1 = arith.constant 0 : i32
    return %c0_i32, %c0_i32_0 : i32, i32
  }
  func.func @transform_6(%arg0: i32) -> (i32, i32) {
    %c0_i32 = arith.constant 0 : i32
    %c0_i32_0 = arith.constant 0 : i32
    %c0_i32_1 = arith.constant 0 : i32
    return %c0_i32, %c0_i32_0 : i32, i32
  }
  func.func @transform_7(%arg0: i32) -> (i32, i32) {
    %c0_i32 = arith.constant 0 : i32
    %c0_i32_0 = arith.constant 0 : i32
    %c0_i32_1 = arith.constant 0 : i32
    return %c0_i32, %c0_i32_0 : i32, i32
  }
  func.func @transform_8(%arg0: i32) -> (i32, i32) {
    %c0_i32 = arith.constant 0 : i32
    %c0_i32_0 = arith.constant 0 : i32
    %c0_i32_1 = arith.constant 0 : i32
    return %c0_i32, %c0_i32_0 : i32, i32
  }
  func.func @transform_9(%arg0: i32) -> (i32, i32, i32) {
    %c0_i32 = arith.constant 0 : i32
    %c0_i32_0 = arith.constant 0 : i32
    %c0_i32_1 = arith.constant 0 : i32
    return %arg0, %c0_i32, %c0_i32_0 : i32, i32, i32
  }
}

</mosaic_0001>

<bundles_post_ra>
// kernel: tpu_custom_call.1
= control target key start
LH: loop header
LB: loop body
LE: loop exit
PB: predicated region body
PF: predicated region fallthrough
CT: control target
= control target key end

     0   :  { %s1981_s0 = inlined_call_operand.vmem [shape: f32[1,16,4], index: 0, kind: input, shape index: {}]   ;;  %s1982_s1 = inlined_call_operand.vmem [shape: f32[4,128], index: 1, kind: input, shape index: {}]   ;;  %s1983_s2 = inlined_call_operand.vmem [shape: f32[1,128], index: 2, kind: input, shape index: {}]   ;;  %s1984_s3 = inlined_call_operand.hbm [shape: f32[32,128], index: 3, kind: input, shape index: {}]   ;;  %s1985_s4 = inlined_call_operand.hbm [shape: f32[32,128], index: 4, kind: input, shape index: {}]   ;;  %s1986_s5 = inlined_call_operand.vmem [shape: f32[1,128], index: 5, kind: input, shape index: {}]   ;;  %s1987_s6 = inlined_call_operand.hbm [shape: f32[32,128], index: 6, kind: input, shape index: {}]   ;;  %s1988_s7 = inlined_call_operand.vmem [shape: f32[1,32], index: 7, kind: input, shape index: {}]   ;;  %s1989_s8 = inlined_call_operand.<no memory space> [shape: f32[1,1], index: 8, kind: input, shape index: {}]   ;;  %s1990_s9 = inlined_call_operand.vmem [shape: f32[1,16,1], index: 9, kind: output, shape index: {}]  }
   0x1   :  { %v14_v0 = vstv %s1989_s8 }
   0x2   :  { %15 = vst [vmem:[#allocation7] sm:$0x1] %v14_v0 }
   0x3   :  { %16 = vsyncpa [#allocation9], 0 }
   0x4   :  { %17 = vsyncpa [#allocation11], 0  ;;  %s41_s13 = sshll.u32 %s1985_s4, 4  ;;  %s1640_s14 = smov [#allocation10]   ;;  %s42_s13 = int_to_ptr.hbm [resolvable:$true] %s41_s13 }
   0x5   :  { %s43_s15 = sshll.u32 %s1640_s14, 4  ;;  %s28_s18 = sshll.u32 %s1984_s3, 4  ;;  %s44_s15 = int_to_ptr.vmem [resolvable:$true] %s43_s15  ;;  %s29_s18 = int_to_ptr.hbm [resolvable:$true] %s28_s18 }
   0x6   :  { %s1641_s19 = smov 128   ;;  %s1642_s20 = smov 8  }
   0x7   :  { %49 = dma.hbm_to_vmem [thread:$0]  %s42_s13, 512, %s44_s15, [#allocation11], %s1641_s19, %s1641_s19, %s1642_s20  }
   0x8   :  { %s1643_s8 = smov [#allocation8]   ;;  %s56_s24 = sshll.u32 %s1987_s6, 4  ;;  %s57_s24 = int_to_ptr.hbm [resolvable:$true] %s56_s24 }
   0x9   :  { %s30_s21 = sshll.u32 %s1643_s8, 4  ;;  %s1644_s4 = smov [#allocation12]   ;;  %s31_s21 = int_to_ptr.vmem [resolvable:$true] %s30_s21 }
   0xa   :  { %36 = dma.hbm_to_vmem [thread:$0]  %s29_s18, 512, %s31_s21, [#allocation9], %s1641_s19, %s1641_s19, %s1642_s20  }
   0xb   :  { %s58_s25 = sshll.u32 %s1644_s4, 4  ;;  %s59_s25 = int_to_ptr.vmem [resolvable:$true] %s58_s25 }
   0xc   :  { %64 = dma.hbm_to_vmem [thread:$0]  %s57_s24, 512, %s59_s25, [#allocation11], %s1641_s19, %s1641_s19, %s1642_s20  }
   0xd   :  { %1636 = dma.done.wait [#allocation9], 512  }
   0xe   :  { %1637 = vsyncadd [#allocation9], 4294966784 }
   0xf   :  { %1638 = dma.done.wait [#allocation11], 1024  }
  0x10   :  { %1639 = vsyncadd [#allocation11], 4294966272  ;;  %vm85_vm0 = vcmask 254976   ;;  %v1645_v1 = vmov 0.0   ;;  %vm104_vm1 = vcmask 1043456   ;;  %vm97_vm2 = vcmask 31744  }
  0x11   :  { %86 = vst.msk [vmem:[#allocation2] sm:$0x3] %vm85_vm0, %v1645_v1  ;;  %v134_v2 = vld [vmem:[#allocation8 + $0x18] sm:$0xff]  ;;  %v133_v3 = vld [vmem:[#allocation8 + $0x10] sm:$0xff]  ;;  %v92_v4 = vld [vmem:[%s1982_s1] sm:$0xf] }
  0x12   :  { %87 = vst.msk [vmem:[#allocation3] sm:$0x3] %vm85_vm0, %v1645_v1  ;;  %153 = vmatpush.msra.mxu1 %v134_v2  ;;  %1386 = vmatpush.msk.msra.mxu0 %vm104_vm1, %v92_v4  ;;  %v90_v5 = vld [vmem:[%s1981_s0] sm:$0xff]  ;;  %vm137_vm3 = vcmask 261120   ;;  %s1646_s29 = smov 64   ;;  %s1647_s30 = smov 32  }
  0x13   :  { %88 = vst.msk [vmem:[#allocation4] sm:$0x3] %vm85_vm0, %v1645_v1  ;;  %v132_v6 = vld [vmem:[#allocation8 + $0x8] sm:$0xff]  ;;  %1387 = vmatmul.msk.f32.vlgmr.msra.gmra.mxu0 %vm97_vm2, %v90_v5  ;;  %223 = vmatpush.msra.mxu2 %v134_v2  ;;  %v131_v7 = vld [vmem:[#allocation8] sm:$0xff] }
  0x14   :  { %89 = vst.msk [vmem:[#allocation5] sm:$0x3] %vm85_vm0, %v1645_v1  ;;  %154 = vmatpush.msra.mxu1 %v133_v3  ;;  %298 = vmatpush.msra.mxu3 %v134_v2  ;;  %v1726_v9 = vld [vmem:[%s1983_s2] ss:$0 sm:$0xff] }
  0x15   :  { %224 = vmatpush.msra.mxu2 %v133_v3  ;;  %590 = vmatpush.msrb.mxu0 %v134_v2 }
  0x16   :  { %155 = vmatpush.msra.mxu1 %v132_v6  ;;  %299 = vmatpush.msra.mxu3 %v133_v3 }
  0x17   :  { %225 = vmatpush.msra.mxu2 %v132_v6  ;;  %591 = vmatpush.msrb.mxu0 %v133_v3 }
  0x18   :  { %v135_v8 = vld [vmem:[#allocation2] sm:$0x3]  ;;  %156 = vmatpush.msra.mxu1 %v131_v7  ;;  %300 = vmatpush.msra.mxu3 %v132_v6 }
  0x19   :  { %1389 = vmatmul.msk.f32.vlgmr.msra.gmra.mxu1 %vm137_vm3, %v135_v8  ;;  %226 = vmatpush.msra.mxu2 %v131_v7  ;;  %v136_v15 = vld [vmem:[#allocation3] sm:$0x3] }
  0x1a   :  { %301 = vmatpush.msra.mxu3 %v131_v7  ;;  %373 = vmatpush.msrb.mxu1 %v134_v2 }
  0x1b   :  { %448 = vmatpush.msrb.mxu2 %v134_v2  ;;  %592 = vmatpush.msrb.mxu0 %v132_v6 }
  0x1c   :  { %516 = vmatpush.msrb.mxu3 %v134_v2  ;;  %374 = vmatpush.msrb.mxu1 %v133_v3 }
  0x1d   :  { %449 = vmatpush.msrb.mxu2 %v133_v3  ;;  %593 = vmatpush.msrb.mxu0 %v131_v7 }
  0x1e   :  { %517 = vmatpush.msrb.mxu3 %v133_v3  ;;  %375 = vmatpush.msrb.mxu1 %v132_v6 }
  0x1f   :  { %450 = vmatpush.msrb.mxu2 %v132_v6 }
  0x20   :  { %518 = vmatpush.msrb.mxu3 %v132_v6  ;;  %376 = vmatpush.msrb.mxu1 %v131_v7 }
  0x21   :  { %451 = vmatpush.msrb.mxu2 %v131_v7 }
  0x22   :  { %519 = vmatpush.msrb.mxu3 %v131_v7  ;;  %664 = vmatpush.msra.mxu1 %v134_v2 }
  0x24   :  { %665 = vmatpush.msra.mxu1 %v133_v3 }
  0x26   :  { %666 = vmatpush.msra.mxu1 %v132_v6 }
  0x28   :  { %667 = vmatpush.msra.mxu1 %v131_v7 }
  0x90   :  { %v125_v10 = vpop.f32.mrf.mxu0 }
  0x91   :  { %v1729_v11 = vadd.f32 %v1726_v9, %v125_v10 }
  0x96   :  { %v158_v12 = vpop.f32.mrf.mxu1 }
  0x97   :  { %v161_v13 = vadd.f32 %v158_v12, %v1729_v11 }
  0x99   :  { %1436 = vtanh.f32 %v161_v13  ;;  %v1390_v16 = vmul.f32 -1.442695, %v161_v13 }
  0x9b   :  { %1438 = vpow2.f32 %v1390_v16 }
  0x9f   :  { %v1437_v14 = vpop.eup %1436 }
  0xa0   :  { %188 = vrot.lane.b32.xlu0 %v1437_v14, %s1646_s29 }
  0xa1   :  { %v1439_v17 = vpop.eup %1438 }
  0xa2   :  { %v165_v18 = vadd.f32 1.0, %v1439_v17 }
  0xa4   :  { %1440 = vrcp.f32 %v165_v18  ;;  %v177_v24 = vand.u32 2147483648, %v165_v18  ;;  %vm171_vm5 = vweird.f32 %v165_v18  ;;  %v175_v25 = vand.u32 2147483647, %v165_v18 }
  0xa6   :  { %v178_v27 = vor.u32 1.1754944e-38, %v177_v24  ;;  %vm176_vm7 = vcmp.eq.f32.partialorder %v175_v25, 8.507059e+37 }
  0xa8   :  { %183 = vrot.lane.b32.xlu0 %v136_v15, %s1647_s30 }
  0xaa   :  { %v1441_v19 = vpop.eup %1440 }
  0xab   :  { %v167_v20 = vmul.f32 %v1441_v19, %v165_v18  ;;  %vm172_vm4 = vweird.f32 %v1441_v19 }
  0xac   :  { %vm173_vm6 = vmor %vm171_vm5, %vm172_vm4 }
  0xad   :  { %v168_v21 = vsub.f32 1.0, %v167_v20 }
  0xaf   :  { %v169_v22 = vmul.f32 %v1441_v19, %v168_v21 }
  0xb1   :  { %v170_v23 = vadd.f32 %v1441_v19, %v169_v22 }
  0xb3   :  { %v174_v26 = vsel %vm173_vm6, %v1441_v19, %v170_v23 }
  0xb4   :  { %v179_v29 = vsel %vm176_vm7, %v178_v27, %v174_v26 }
 0x112   :  { %v189_v28 = vpop.permute.xlu0 %188 }
 0x113   :  { %v191_v30 = vmul.f32 %v189_v28, %v179_v29 }
 0x115   :  { %193 = vrot.lane.b32.xlu1 %v191_v30, %s1647_s30 }
 0x11a   :  { %v184_v31 = vpop.permute.xlu0 %183 }
 0x11b   :  { %v186_v32 = vmul.f32 %v184_v31, %v179_v29 }
 0x187   :  { %v194_v33 = vpop.permute.xlu1 %193 }
 0x188   :  { %v196_v34 = vadd.f32 %v194_v33, %v186_v32 }
 0x18a   :  { %1442 = vtanh.f32 %v196_v34  ;;  %v256_v58 = vrot.slane %v196_v34, 6 }
 0x190   :  { %v1443_v35 = vpop.eup %1442 }
 0x191   :  { %199 = vrot.lane.b32.xlu1 %v1443_v35, %s1646_s29 }
 0x203   :  { %v200_v36 = vpop.permute.xlu1 %199 }
 0x204   :  { %v202_v37 = vmul.f32 %v200_v36, %v179_v29 }
 0x206   :  { %204 = vrot.lane.b32.xlu2 %v202_v37, %s1647_s30 }
 0x260   :  { %v205_v38 = vpop.permute.xlu2 %204 }
 0x261   :  { %208 = vst.msk [vmem:[#allocation6] sm:$0x3] %vm85_vm0, %v205_v38  ;;  %1391 = vmatmul.msk.f32.vlgmr.msra.gmra.mxu2 %vm137_vm3, %v205_v38 }
 0x2e4   :  { %v228_v39 = vpop.f32.mrf.mxu2 }
 0x2e5   :  { %v232_v40 = vrot.slane %v228_v39, 6 }
 0x2e7   :  { %v234_v41 = vadd.f32 %v232_v40, %v1729_v11 }
 0x2e9   :  { %1444 = vtanh.f32 %v234_v41  ;;  %v1392_v43 = vmul.f32 -1.442695, %v234_v41 }
 0x2eb   :  { %1446 = vpow2.f32 %v1392_v43 }
 0x2ef   :  { %v1445_v42 = vpop.eup %1444 }
 0x2f0   :  { %260 = vrot.lane.b32.xlu2 %v1445_v42, %s1646_s29 }
 0x2f1   :  { %v1447_v44 = vpop.eup %1446 }
 0x2f2   :  { %v238_v45 = vadd.f32 1.0, %v1447_v44 }
 0x2f4   :  { %1448 = vrcp.f32 %v238_v45  ;;  %v250_v51 = vand.u32 2147483648, %v238_v45  ;;  %vm244_vm9 = vweird.f32 %v238_v45  ;;  %v248_v52 = vand.u32 2147483647, %v238_v45 }
 0x2f6   :  { %v251_v54 = vor.u32 1.1754944e-38, %v250_v51  ;;  %vm249_vm11 = vcmp.eq.f32.partialorder %v248_v52, 8.507059e+37 }
 0x2fa   :  { %v1449_v46 = vpop.eup %1448 }
 0x2fb   :  { %v240_v47 = vmul.f32 %v1449_v46, %v238_v45  ;;  %vm245_vm8 = vweird.f32 %v1449_v46 }
 0x2fc   :  { %vm246_vm10 = vmor %vm244_vm9, %vm245_vm8 }
 0x2fd   :  { %v241_v48 = vsub.f32 1.0, %v240_v47 }
 0x2ff   :  { %v242_v49 = vmul.f32 %v1449_v46, %v241_v48 }
 0x301   :  { %v243_v50 = vadd.f32 %v1449_v46, %v242_v49 }
 0x303   :  { %v247_v53 = vsel %vm246_vm10, %v1449_v46, %v243_v50  ;;  %vm279_vm10 = vcmask 257026  }
 0x304   :  { %v252_v56 = vsel %vm249_vm11, %v251_v54, %v247_v53  ;;  %vm354_vm11 = vcmask 259076  }
 0x305   :  { %v258_v59 = vmul.f32 %v256_v58, %v252_v56 }
 0x34a   :  { %v261_v55 = vpop.permute.xlu2 %260 }
 0x34b   :  { %v263_v57 = vmul.f32 %v261_v55, %v252_v56 }
 0x34d   :  { %265 = vrot.lane.b32.xlu0 %v263_v57, %s1647_s30 }
 0x3bf   :  { %v266_v60 = vpop.permute.xlu0 %265 }
 0x3c0   :  { %v268_v61 = vadd.f32 %v266_v60, %v258_v59  ;;  %v91_v59 = vld [vmem:[%s1981_s0 + $0x8] sm:$0xff] }
 0x3c1   :  { %1388 = vmatmul.msk.f32.gmra.mxu0 %vm97_vm2, %v91_v59 }
 0x3c2   :  { %1450 = vtanh.f32 %v268_v61  ;;  %v331_v24 = vrot.slane %v268_v61, 6 }
 0x3c8   :  { %v1451_v62 = vpop.eup %1450 }
 0x3c9   :  { %271 = vrot.lane.b32.xlu1 %v1451_v62, %s1646_s29 }
 0x43b   :  { %v272_v63 = vpop.permute.xlu1 %271 }
 0x43c   :  { %v1743_v0 = vmul.f32 %v272_v63, %v252_v56 }
 0x43e   :  { %v281_v1 = vrot.slane %v1743_v0, 2  ;;  %v128_v61 = vpop.f32.mrf.mxu0 }
 0x43f   :  { %v1768_v62 = vadd.f32 %v1726_v9, %v128_v61 }
 0x440   :  { %282 = vrot.lane.b32.xlu2 %v281_v1, %s1647_s30 }
 0x49a   :  { %v283_v2 = vpop.permute.xlu2 %282 }
 0x49b   :  { %1393 = vmatmul.msk.f32.vlgmr.msra.gmra.mxu3 %vm137_vm3, %v283_v2 }
 0x51e   :  { %v303_v3 = vpop.f32.mrf.mxu3 }
 0x51f   :  { %v307_v4 = vrot.slane %v303_v3, 4 }
 0x521   :  { %v309_v5 = vadd.f32 %v307_v4, %v1729_v11 }
 0x523   :  { %1452 = vtanh.f32 %v309_v5  ;;  %v1394_v7 = vmul.f32 -1.442695, %v309_v5 }
 0x525   :  { %1454 = vpow2.f32 %v1394_v7 }
 0x529   :  { %v1453_v6 = vpop.eup %1452 }
 0x52a   :  { %335 = vrot.lane.b32.xlu0 %v1453_v6, %s1646_s29 }
 0x52b   :  { %v1455_v8 = vpop.eup %1454 }
 0x52c   :  { %v313_v10 = vadd.f32 1.0, %v1455_v8 }
 0x52e   :  { %1456 = vrcp.f32 %v313_v10  ;;  %v325_v17 = vand.u32 2147483648, %v313_v10  ;;  %vm319_vm13 = vweird.f32 %v313_v10  ;;  %v323_v18 = vand.u32 2147483647, %v313_v10 }
 0x530   :  { %v326_v20 = vor.u32 1.1754944e-38, %v325_v17  ;;  %vm324_vm15 = vcmp.eq.f32.partialorder %v323_v18, 8.507059e+37 }
 0x534   :  { %v1457_v12 = vpop.eup %1456 }
 0x535   :  { %v315_v13 = vmul.f32 %v1457_v12, %v313_v10  ;;  %vm320_vm12 = vweird.f32 %v1457_v12 }
 0x536   :  { %vm321_vm14 = vmor %vm319_vm13, %vm320_vm12  ;;  %vm429_vm12 = vcmask 261126  }
 0x537   :  { %v316_v14 = vsub.f32 1.0, %v315_v13 }
 0x539   :  { %v317_v15 = vmul.f32 %v1457_v12, %v316_v14 }
 0x53b   :  { %v318_v16 = vadd.f32 %v1457_v12, %v317_v15 }
 0x53d   :  { %v322_v19 = vsel %vm321_vm14, %v1457_v12, %v318_v16 }
 0x53e   :  { %v327_v22 = vsel %vm324_vm15, %v326_v20, %v322_v19 }
 0x53f   :  { %v333_v25 = vmul.f32 %v331_v24, %v327_v22 }
 0x59c   :  { %v336_v21 = vpop.permute.xlu0 %335 }
 0x59d   :  { %v338_v23 = vmul.f32 %v336_v21, %v327_v22 }
 0x59f   :  { %340 = vrot.lane.b32.xlu1 %v338_v23, %s1647_s30 }
 0x611   :  { %v341_v26 = vpop.permute.xlu1 %340 }
 0x612   :  { %v343_v27 = vadd.f32 %v341_v26, %v333_v25 }
 0x614   :  { %1458 = vtanh.f32 %v343_v27  ;;  %v406_v51 = vrot.slane %v343_v27, 6  ;;  %v732_v27 = vld [vmem:[#allocation10 + $0x18] sm:$0xff] }
 0x615   :  { %755 = vmatpush.msra.mxu2 %v732_v27 }
 0x61a   :  { %v1459_v28 = vpop.eup %1458 }
 0x61b   :  { %346 = vrot.lane.b32.xlu2 %v1459_v28, %s1646_s29  ;;  %v731_v28 = vld [vmem:[#allocation10 + $0x10] sm:$0xff] }
 0x61c   :  { %756 = vmatpush.msra.mxu2 %v731_v28 }
 0x675   :  { %v347_v29 = vpop.permute.xlu2 %346 }
 0x676   :  { %v1752_v30 = vmul.f32 %v347_v29, %v327_v22  ;;  %v1785_v29 = vld [vmem:[#allocation12 + $0x18] sm:$0xff] }
 0x677   :  { %787 = vmatpush.msra.mxu3 %v1785_v29  ;;  %856 = vmatpush.msra.mxu0 %v1785_v29 }
 0x678   :  { %v356_v31 = vrot.slane %v1752_v30, 4 }
 0x67a   :  { %357 = vrot.lane.b32.xlu0 %v356_v31, %s1647_s30  ;;  %v1788_v31 = vld [vmem:[#allocation12 + $0x10] sm:$0xff] }
 0x67b   :  { %788 = vmatpush.msra.mxu3 %v1788_v31  ;;  %857 = vmatpush.msra.mxu0 %v1788_v31 }
 0x6ec   :  { %v358_v32 = vpop.permute.xlu0 %357 }
 0x6ed   :  { %1395 = vmatmul.msk.f32.vlgmr.msrb.gmra.mxu1 %vm137_vm3, %v358_v32  ;;  %v1790_v32 = vld [vmem:[#allocation12 + $0x8] sm:$0xff] }
 0x6ee   :  { %930 = vmatpush.msrb.mxu1 %v1785_v29  ;;  %789 = vmatpush.msra.mxu3 %v1790_v32 }
 0x6ef   :  { %858 = vmatpush.msra.mxu0 %v1790_v32 }
 0x6f0   :  { %931 = vmatpush.msrb.mxu1 %v1788_v31 }
 0x6f2   :  { %932 = vmatpush.msrb.mxu1 %v1790_v32 }
 0x76a   :  { %v378_v33 = vpop.f32.mrf.mxu1 }
 0x76b   :  { %v382_v34 = vrot.slane %v378_v33, 2  ;;  %v729_v33 = vld [vmem:[#allocation10] sm:$0xff] }
 0x76d   :  { %v384_v35 = vadd.f32 %v382_v34, %v1729_v11  ;;  %v1800_v34 = vld [vmem:[#allocation12] sm:$0xff] }
 0x76e   :  { %790 = vmatpush.msra.mxu3 %v1800_v34  ;;  %859 = vmatpush.msra.mxu0 %v1800_v34 }
 0x76f   :  { %1460 = vtanh.f32 %v384_v35  ;;  %v1396_v37 = vmul.f32 -1.442695, %v384_v35  ;;  %933 = vmatpush.msrb.mxu1 %v1800_v34 }
 0x771   :  { %1462 = vpow2.f32 %v1396_v37 }
 0x775   :  { %v1461_v36 = vpop.eup %1460 }
 0x776   :  { %410 = vrot.lane.b32.xlu1 %v1461_v36, %s1646_s29  ;;  %v770_v36 = vld [vmem:[#allocation4] sm:$0x3] }
 0x777   :  { %v1463_v38 = vpop.eup %1462 }
 0x778   :  { %v388_v39 = vadd.f32 1.0, %v1463_v38 }
 0x77a   :  { %1464 = vrcp.f32 %v388_v39  ;;  %v400_v45 = vand.u32 2147483648, %v388_v39  ;;  %vm394_vm4 = vweird.f32 %v388_v39  ;;  %v398_v46 = vand.u32 2147483647, %v388_v39 }
 0x77c   :  { %v401_v47 = vor.u32 1.1754944e-38, %v400_v45  ;;  %vm399_vm6 = vcmp.eq.f32.partialorder %v398_v46, 8.507059e+37 }
 0x780   :  { %v1465_v40 = vpop.eup %1464 }
 0x781   :  { %v390_v41 = vmul.f32 %v1465_v40, %v388_v39  ;;  %vm395_vm1 = vweird.f32 %v1465_v40 }
 0x782   :  { %vm396_vm5 = vmor %vm394_vm4, %vm395_vm1 }
 0x783   :  { %v391_v42 = vsub.f32 1.0, %v390_v41 }
 0x785   :  { %v392_v43 = vmul.f32 %v1465_v40, %v391_v42 }
 0x787   :  { %v393_v44 = vadd.f32 %v1465_v40, %v392_v43  ;;  %v1827_v43 = vld [vmem:[%s1986_s5] ss:$0 sm:$0xff]  ;;  %s1648_s5 = smov 96  }
 0x789   :  { %v397_v11 = vsel %vm396_vm5, %v1465_v40, %v393_v44 }
 0x78a   :  { %v402_v49 = vsel %vm399_vm6, %v401_v47, %v397_v11  ;;  %v771_v11 = vld [vmem:[#allocation5] sm:$0x3] }
 0x78b   :  { %v408_v52 = vmul.f32 %v406_v51, %v402_v49 }
 0x7e8   :  { %v411_v48 = vpop.permute.xlu1 %410 }
 0x7e9   :  { %v413_v50 = vmul.f32 %v411_v48, %v402_v49 }
 0x7eb   :  { %415 = vrot.lane.b32.xlu2 %v413_v50, %s1647_s30 }
 0x845   :  { %v416_v53 = vpop.permute.xlu2 %415 }
 0x846   :  { %v418_v54 = vadd.f32 %v416_v53, %v408_v52 }
 0x848   :  { %1466 = vtanh.f32 %v418_v54  ;;  %v478_v19 = vrot.slane %v418_v54, 6 }
 0x84e   :  { %v1467_v55 = vpop.eup %1466 }
 0x84f   :  { %421 = vrot.lane.b32.xlu0 %v1467_v55, %s1646_s29 }
 0x8c1   :  { %v422_v56 = vpop.permute.xlu0 %421 }
 0x8c2   :  { %v424_v57 = vmul.f32 %v422_v56, %v402_v49 }
 0x8c4   :  { %v431_v58 = vrot.slane %v424_v57, 6 }
 0x8c6   :  { %432 = vrot.lane.b32.xlu1 %v431_v58, %s1647_s30 }
 0x938   :  { %v433_v60 = vpop.permute.xlu1 %432 }
 0x939   :  { %1397 = vmatmul.msk.f32.vlgmr.msrb.gmra.mxu2 %vm137_vm3, %v433_v60 }
 0x9bc   :  { %v453_v63 = vpop.f32.mrf.mxu2 }
 0x9bd   :  { %v456_v1 = vadd.f32 %v453_v63, %v1768_v62 }
 0x9bf   :  { %1468 = vtanh.f32 %v456_v1  ;;  %v1398_v3 = vmul.f32 -1.442695, %v456_v1 }
 0x9c1   :  { %1470 = vpow2.f32 %v1398_v3 }
 0x9c5   :  { %v1469_v2 = vpop.eup %1468 }
 0x9c6   :  { %482 = vrot.lane.b32.xlu2 %v1469_v2, %s1646_s29 }
 0x9c7   :  { %v1471_v4 = vpop.eup %1470 }
 0x9c8   :  { %v460_v5 = vadd.f32 1.0, %v1471_v4 }
 0x9ca   :  { %1472 = vrcp.f32 %v460_v5  ;;  %v472_v9 = vand.u32 2147483648, %v460_v5  ;;  %vm466_vm7 = vweird.f32 %v460_v5  ;;  %v470_v13 = vand.u32 2147483647, %v460_v5 }
 0x9cc   :  { %v473_v15 = vor.u32 1.1754944e-38, %v472_v9  ;;  %vm471_vm9 = vcmp.eq.f32.partialorder %v470_v13, 8.507059e+37 }
 0x9d0   :  { %v1473_v6 = vpop.eup %1472 }
 0x9d1   :  { %v462_v7 = vmul.f32 %v1473_v6, %v460_v5  ;;  %vm467_vm2 = vweird.f32 %v1473_v6 }
 0x9d2   :  { %vm468_vm8 = vmor %vm466_vm7, %vm467_vm2 }
 0x9d3   :  { %v463_v8 = vsub.f32 1.0, %v462_v7 }
 0x9d5   :  { %v464_v10 = vmul.f32 %v1473_v6, %v463_v8 }
 0x9d7   :  { %v465_v12 = vadd.f32 %v1473_v6, %v464_v10 }
 0x9d9   :  { %v469_v14 = vsel %vm468_vm8, %v1473_v6, %v465_v12 }
 0x9da   :  { %v474_v17 = vsel %vm471_vm9, %v473_v15, %v469_v14 }
 0x9db   :  { %v480_v20 = vmul.f32 %v478_v19, %v474_v17 }
 0xa20   :  { %v483_v16 = vpop.permute.xlu2 %482 }
 0xa21   :  { %v485_v18 = vmul.f32 %v483_v16, %v474_v17 }
 0xa23   :  { %487 = vrot.lane.b32.xlu0 %v485_v18, %s1647_s30 }
 0xa2b   :  { %276 = vrot.lane.b32.xlu0 %v1743_v0, %s1647_s30 }
 0xa95   :  { %v488_v21 = vpop.permute.xlu0 %487 }
 0xa96   :  { %v1775_v22 = vadd.f32 %v488_v21, %v480_v20 }
 0xa98   :  { %1474 = vtanh.f32 %v1775_v22  ;;  %v549_v18 = vrot.slane %v1775_v22, 6 }
 0xa9d   :  { %v277_v23 = vpop.permute.xlu0 %276 }
 0xa9e   :  { %v1475_v24 = vpop.eup %1474  ;;  %280 = vst.msk [vmem:[#allocation6] sm:$0xc] %vm279_vm10, %v277_v23 }
 0xa9f   :  { %493 = vrot.lane.b32.xlu1 %v1475_v24, %s1646_s29 }
 0xaa7   :  { %351 = vrot.lane.b32.xlu1 %v1752_v30, %s1647_s30  ;;  %v730_v30 = vld [vmem:[#allocation10 + $0x8] sm:$0xff] }
 0xaa8   :  { %757 = vmatpush.msra.mxu2 %v730_v30 }
 0xaaa   :  { %758 = vmatpush.msra.mxu2 %v729_v33 }
 0xaac   :  { %1220 = vmatpush.msrb.mxu2 %v1785_v29 }
 0xaae   :  { %1221 = vmatpush.msrb.mxu2 %v1788_v31 }
 0xab0   :  { %1222 = vmatpush.msrb.mxu2 %v1790_v32 }
 0xab2   :  { %1223 = vmatpush.msrb.mxu2 %v1800_v34 }
 0xb11   :  { %v494_v25 = vpop.permute.xlu1 %493 }
 0xb12   :  { %v496_v26 = vmul.f32 %v494_v25, %v474_v17 }
 0xb14   :  { %498 = vrot.lane.b32.xlu2 %v496_v26, %s1647_s30 }
 0xb19   :  { %v352_v0 = vpop.permute.xlu1 %351 }
 0xb1a   :  { %355 = vst.msk [vmem:[#allocation6] sm:$0x30] %vm354_vm11, %v352_v0 }
 0xb1c   :  { %426 = vrot.lane.b32.xlu2 %v424_v57, %s1647_s30 }
 0xb6e   :  { %v499_v35 = vpop.permute.xlu2 %498 }
 0xb6f   :  { %501 = vst.msk [vmem:[#allocation6 + $0x8] sm:$0x3] %vm85_vm0, %v499_v35  ;;  %1399 = vmatmul.msk.f32.vlgmr.msrb.gmra.mxu3 %vm137_vm3, %v499_v35 }
 0xb70   :  { %1004 = vmatpush.msrb.mxu3 %v1785_v29 }
 0xb72   :  { %1005 = vmatpush.msrb.mxu3 %v1788_v31 }
 0xb74   :  { %1006 = vmatpush.msrb.mxu3 %v1790_v32 }
 0xb76   :  { %v427_v37 = vpop.permute.xlu2 %426  ;;  %1007 = vmatpush.msrb.mxu3 %v1800_v34 }
 0xb77   :  { %430 = vst.msk [vmem:[#allocation6] sm:$0xc0] %vm429_vm12, %v427_v37  ;;  %1407 = vmatmul.msk.f32.vlgmr.msra.gmra.mxu3 %vm137_vm3, %v770_v36 }
 0xb78   :  { %1294 = vmatpush.msra.mxu3 %v1785_v29 }
 0xb7a   :  { %1295 = vmatpush.msra.mxu3 %v1788_v31 }
 0xb7c   :  { %1296 = vmatpush.msra.mxu3 %v1790_v32 }
 0xb7e   :  { %v727_v38 = vld [vmem:[#allocation6] sm:$0xff]  ;;  %1297 = vmatpush.msra.mxu3 %v1800_v34 }
 0xb7f   :  { %1405 = vmatmul.msk.f32.vlgmr.msra.gmra.mxu2 %vm137_vm3, %v727_v38 }
 0xbf2   :  { %v521_v39 = vpop.f32.mrf.mxu3 }
 0xbf3   :  { %v525_v40 = vrot.slane %v521_v39, 6 }
 0xbf5   :  { %v527_v41 = vadd.f32 %v525_v40, %v1768_v62 }
 0xbf7   :  { %1476 = vtanh.f32 %v527_v41  ;;  %v1400_v49 = vmul.f32 -1.442695, %v527_v41 }
 0xbfa   :  { %v792_v45 = vpop.f32.mrf.mxu3 }
 0xbfd   :  { %v1477_v42 = vpop.eup %1476 }
 0xbfe   :  { %553 = vrot.lane.b32.xlu0 %v1477_v42, %s1646_s29 }
 0xc02   :  { %v760_v44 = vpop.f32.mrf.mxu2 }
 0xc03   :  { %v1830_v46 = vadd.f32 %v1827_v43, %v760_v44 }
 0xc05   :  { %v795_v47 = vadd.f32 %v792_v45, %v1830_v46 }
 0xc06   :  { %817 = vrot.lane.b32.xlu0 %v771_v11, %s1647_s30 }
 0xc07   :  { %1478 = vtanh.f32 %v795_v47  ;;  %v1408_v52 = vmul.f32 -1.442695, %v795_v47 }
 0xc08   :  { %1480 = vpow2.f32 %v1400_v49 }
 0xc0d   :  { %v1479_v48 = vpop.eup %1478 }
 0xc0e   :  { %822 = vrot.lane.b32.xlu1 %v1479_v48, %s1646_s29  ;;  %v1481_v50 = vpop.eup %1480 }
 0xc0f   :  { %v531_v51 = vadd.f32 1.0, %v1481_v50 }
 0xc11   :  { %1482 = vrcp.f32 %v531_v51  ;;  %v543_v61 = vand.u32 2147483648, %v531_v51  ;;  %vm537_vm14 = vweird.f32 %v531_v51  ;;  %v541_v63 = vand.u32 2147483647, %v531_v51 }
 0xc12   :  { %1484 = vpow2.f32 %v1408_v52 }
 0xc13   :  { %v544_v3 = vor.u32 1.1754944e-38, %v543_v61  ;;  %vm542_vm1 = vcmp.eq.f32.partialorder %v541_v63, 8.507059e+37 }
 0xc17   :  { %v1483_v53 = vpop.eup %1482 }
 0xc18   :  { %v1485_v54 = vpop.eup %1484  ;;  %v533_v55 = vmul.f32 %v1483_v53, %v531_v51  ;;  %vm538_vm13 = vweird.f32 %v1483_v53 }
 0xc19   :  { %v799_v56 = vadd.f32 1.0, %v1485_v54  ;;  %vm539_vm15 = vmor %vm537_vm14, %vm538_vm13 }
 0xc1a   :  { %v534_v57 = vsub.f32 1.0, %v533_v55 }
 0xc1b   :  { %1486 = vrcp.f32 %v799_v56  ;;  %v811_v12 = vand.u32 2147483648, %v799_v56  ;;  %vm805_vm5 = vweird.f32 %v799_v56  ;;  %v809_v9 = vand.u32 2147483647, %v799_v56 }
 0xc1c   :  { %v535_v58 = vmul.f32 %v1483_v53, %v534_v57 }
 0xc1d   :  { %v812_v14 = vor.u32 1.1754944e-38, %v811_v12  ;;  %vm810_vm2 = vcmp.eq.f32.partialorder %v809_v9, 8.507059e+37 }
 0xc1e   :  { %v536_v59 = vadd.f32 %v1483_v53, %v535_v58 }
 0xc20   :  { %v540_v1 = vsel %vm539_vm15, %v1483_v53, %v536_v59 }
 0xc21   :  { %v1487_v60 = vpop.eup %1486  ;;  %v545_v5 = vsel %vm542_vm1, %v544_v3, %v540_v1 }
 0xc22   :  { %v801_v2 = vmul.f32 %v1487_v60, %v799_v56  ;;  %vm806_vm4 = vweird.f32 %v1487_v60  ;;  %v551_v19 = vmul.f32 %v549_v18, %v545_v5 }
 0xc23   :  { %vm807_vm6 = vmor %vm805_vm5, %vm806_vm4 }
 0xc24   :  { %v802_v7 = vsub.f32 1.0, %v801_v2 }
 0xc26   :  { %v803_v8 = vmul.f32 %v1487_v60, %v802_v7 }
 0xc28   :  { %v804_v10 = vadd.f32 %v1487_v60, %v803_v8 }
 0xc2a   :  { %v808_v13 = vsel %vm807_vm6, %v1487_v60, %v804_v10 }
 0xc2b   :  { %v813_v15 = vsel %vm810_vm2, %v812_v14, %v808_v13 }
 0xc70   :  { %v554_v4 = vpop.permute.xlu0 %553 }
 0xc71   :  { %v556_v6 = vmul.f32 %v554_v4, %v545_v5 }
 0xc73   :  { %558 = vrot.lane.b32.xlu2 %v556_v6, %s1647_s30 }
 0xc78   :  { %v818_v24 = vpop.permute.xlu0 %817 }
 0xc79   :  { %v820_v25 = vmul.f32 %v818_v24, %v813_v15 }
 0xc80   :  { %v823_v16 = vpop.permute.xlu1 %822 }
 0xc81   :  { %v825_v17 = vmul.f32 %v823_v16, %v813_v15 }
 0xc83   :  { %827 = vrot.lane.b32.xlu1 %v825_v17, %s1647_s30 }
 0xccd   :  { %v559_v20 = vpop.permute.xlu2 %558 }
 0xcce   :  { %v1838_v21 = vadd.f32 %v559_v20, %v551_v19 }
 0xcd0   :  { %1488 = vtanh.f32 %v1838_v21  ;;  %v623_v16 = vrot.slane %v1838_v21, 6 }
 0xcd6   :  { %v1489_v23 = vpop.eup %1488 }
 0xcd7   :  { %564 = vrot.lane.b32.xlu2 %v1489_v23, %s1646_s29 }
 0xcf5   :  { %v828_v26 = vpop.permute.xlu1 %827 }
 0xcf6   :  { %v1842_v0 = vadd.f32 %v828_v26, %v820_v25 }
 0xcf8   :  { %1490 = vtanh.f32 %v1842_v0  ;;  %v889_v23 = vrot.slane %v1842_v0, 6 }
 0xcfe   :  { %v1491_v27 = vpop.eup %1490 }
 0xcff   :  { %833 = vrot.lane.b32.xlu0 %v1491_v27, %s1646_s29 }
 0xd31   :  { %v565_v22 = vpop.permute.xlu2 %564 }
 0xd32   :  { %v1846_v28 = vmul.f32 %v565_v22, %v545_v5 }
 0xd34   :  { %v573_v30 = vrot.slane %v1846_v28, 2 }
 0xd36   :  { %574 = vrot.lane.b32.xlu1 %v573_v30, %s1647_s30 }
 0xd71   :  { %v834_v33 = vpop.permute.xlu0 %833 }
 0xd72   :  { %v836_v35 = vmul.f32 %v834_v33, %v813_v15 }
 0xd74   :  { %838 = vrot.lane.b32.xlu2 %v836_v35, %s1647_s30 }
 0xda8   :  { %v575_v36 = vpop.permute.xlu1 %574 }
 0xda9   :  { %1401 = vmatmul.msk.f32.vlgmr.msrb.gmra.mxu0 %vm137_vm3, %v575_v36 }
 0xdaa   :  { %1078 = vmatpush.msrb.mxu0 %v1785_v29 }
 0xdac   :  { %1079 = vmatpush.msrb.mxu0 %v1788_v31 }
 0xdae   :  { %1080 = vmatpush.msrb.mxu0 %v1790_v32 }
 0xdb0   :  { %1081 = vmatpush.msrb.mxu0 %v1800_v34 }
 0xdce   :  { %v839_v37 = vpop.permute.xlu2 %838 }
 0xdcf   :  { %841 = vst.msk [vmem:[#allocation6] sm:$0x3] %vm85_vm0, %v839_v37  ;;  %1409 = vmatmul.msk.f32.vlgmr.msra.gmra.mxu0 %vm137_vm3, %v839_v37 }
 0xe26   :  { %v595_v38 = vpop.f32.mrf.mxu0 }
 0xe27   :  { %v599_v39 = vrot.slane %v595_v38, 4 }
 0xe29   :  { %v601_v40 = vadd.f32 %v599_v39, %v1768_v62 }
 0xe2b   :  { %1492 = vtanh.f32 %v601_v40  ;;  %v1402_v47 = vmul.f32 -1.442695, %v601_v40 }
 0xe31   :  { %v1493_v41 = vpop.eup %1492 }
 0xe32   :  { %627 = vrot.lane.b32.xlu0 %v1493_v41, %s1646_s29 }
 0xe4c   :  { %v861_v42 = vpop.f32.mrf.mxu0 }
 0xe4d   :  { %v865_v44 = vrot.slane %v861_v42, 6 }
 0xe4f   :  { %v867_v45 = vadd.f32 %v865_v44, %v1830_v46 }
 0xe51   :  { %1494 = vtanh.f32 %v867_v45  ;;  %v1410_v54 = vmul.f32 -1.442695, %v867_v45 }
 0xe52   :  { %1496 = vpow2.f32 %v1402_v47 }
 0xe57   :  { %v1495_v11 = vpop.eup %1494 }
 0xe58   :  { %893 = vrot.lane.b32.xlu1 %v1495_v11, %s1646_s29  ;;  %v1497_v48 = vpop.eup %1496 }
 0xe59   :  { %v605_v49 = vadd.f32 1.0, %v1497_v48 }
 0xe5b   :  { %1498 = vrcp.f32 %v605_v49  ;;  %v617_v56 = vand.u32 2147483648, %v605_v49  ;;  %vm611_vm8 = vweird.f32 %v605_v49  ;;  %v615_v57 = vand.u32 2147483647, %v605_v49 }
 0xe5c   :  { %1500 = vpow2.f32 %v1410_v54 }
 0xe5d   :  { %v618_v59 = vor.u32 1.1754944e-38, %v617_v56  ;;  %vm616_vm13 = vcmp.eq.f32.partialorder %v615_v57, 8.507059e+37 }
 0xe61   :  { %v1499_v50 = vpop.eup %1498 }
 0xe62   :  { %v607_v51 = vmul.f32 %v1499_v50, %v605_v49  ;;  %vm612_vm7 = vweird.f32 %v1499_v50  ;;  %v1501_v1 = vpop.eup %1500 }
 0xe63   :  { %vm613_vm9 = vmor %vm611_vm8, %vm612_vm7  ;;  %v871_v2 = vadd.f32 1.0, %v1501_v1 }
 0xe64   :  { %v608_v52 = vsub.f32 1.0, %v607_v51 }
 0xe65   :  { %1502 = vrcp.f32 %v871_v2  ;;  %v883_v8 = vand.u32 2147483648, %v871_v2  ;;  %vm877_vm15 = vweird.f32 %v871_v2  ;;  %v881_v10 = vand.u32 2147483647, %v871_v2 }
 0xe66   :  { %v609_v53 = vmul.f32 %v1499_v50, %v608_v52 }
 0xe67   :  { %v884_v9 = vor.u32 1.1754944e-38, %v883_v8  ;;  %vm882_vm4 = vcmp.eq.f32.partialorder %v881_v10, 8.507059e+37 }
 0xe68   :  { %v610_v55 = vadd.f32 %v1499_v50, %v609_v53 }
 0xe6a   :  { %v614_v58 = vsel %vm613_vm9, %v1499_v50, %v610_v55 }
 0xe6b   :  { %v619_v60 = vsel %vm616_vm13, %v618_v59, %v614_v58  ;;  %v1503_v3 = vpop.eup %1502 }
 0xe6c   :  { %v873_v4 = vmul.f32 %v1503_v3, %v871_v2  ;;  %vm878_vm14 = vweird.f32 %v1503_v3  ;;  %v625_v17 = vmul.f32 %v623_v16, %v619_v60 }
 0xe6d   :  { %vm879_vm1 = vmor %vm877_vm15, %vm878_vm14 }
 0xe6e   :  { %v874_v5 = vsub.f32 1.0, %v873_v4 }
 0xe70   :  { %v875_v6 = vmul.f32 %v1503_v3, %v874_v5 }
 0xe72   :  { %v876_v7 = vadd.f32 %v1503_v3, %v875_v6 }
 0xe74   :  { %v880_v12 = vsel %vm879_vm1, %v1503_v3, %v876_v7 }
 0xe75   :  { %v885_v14 = vsel %vm882_vm4, %v884_v9, %v880_v12 }
 0xe76   :  { %v891_v24 = vmul.f32 %v889_v23, %v885_v14 }
 0xea4   :  { %v628_v61 = vpop.permute.xlu0 %627 }
 0xea5   :  { %v630_v63 = vmul.f32 %v628_v61, %v619_v60 }
 0xea7   :  { %632 = vrot.lane.b32.xlu2 %v630_v63, %s1647_s30 }
 0xeca   :  { %v894_v13 = vpop.permute.xlu1 %893 }
 0xecb   :  { %v896_v15 = vmul.f32 %v894_v13, %v885_v14 }
 0xecd   :  { %898 = vrot.lane.b32.xlu0 %v896_v15, %s1647_s30 }
 0xf01   :  { %v633_v18 = vpop.permute.xlu2 %632 }
 0xf02   :  { %v1865_v19 = vadd.f32 %v633_v18, %v625_v17 }
 0xf04   :  { %1504 = vtanh.f32 %v1865_v19 }
 0xf0a   :  { %v1505_v20 = vpop.eup %1504 }
 0xf0b   :  { %638 = vrot.lane.b32.xlu1 %v1505_v20, %s1646_s29 }
 0xf3f   :  { %v899_v25 = vpop.permute.xlu0 %898 }
 0xf40   :  { %v901_v26 = vadd.f32 %v899_v25, %v891_v24 }
 0xf42   :  { %1506 = vtanh.f32 %v901_v26  ;;  %v963_v58 = vrot.slane %v901_v26, 6  ;;  %v697_v26 = vrot.slane %v1865_v19, 6 }
 0xf48   :  { %v1507_v27 = vpop.eup %1506 }
 0xf49   :  { %904 = vrot.lane.b32.xlu2 %v1507_v27, %s1646_s29 }
 0xf7d   :  { %v639_v22 = vpop.permute.xlu1 %638 }
 0xf7e   :  { %v1871_v21 = vmul.f32 %v639_v22, %v619_v60 }
 0xf80   :  { %v647_v30 = vrot.slane %v1871_v21, 4 }
 0xf82   :  { %648 = vrot.lane.b32.xlu0 %v647_v30, %s1647_s30 }
 0xfa3   :  { %v905_v33 = vpop.permute.xlu2 %904 }
 0xfa4   :  { %v1875_v35 = vmul.f32 %v905_v33, %v885_v14 }
 0xfa6   :  { %v913_v36 = vrot.slane %v1875_v35, 2 }
 0xfa8   :  { %914 = vrot.lane.b32.xlu1 %v913_v36, %s1647_s30 }
 0xff4   :  { %v649_v0 = vpop.permute.xlu0 %648 }
 0xff5   :  { %1403 = vmatmul.msk.f32.vlgmr.msra.gmra.mxu1 %vm137_vm3, %v649_v0 }
 0xff6   :  { %1146 = vmatpush.msra.mxu1 %v1785_v29 }
 0xff8   :  { %1147 = vmatpush.msra.mxu1 %v1788_v31 }
 0xffa   :  { %1148 = vmatpush.msra.mxu1 %v1790_v32 }
 0xffc   :  { %1149 = vmatpush.msra.mxu1 %v1800_v34 }
0x101a   :  { %v915_v37 = vpop.permute.xlu1 %914 }
0x101b   :  { %1411 = vmatmul.msk.f32.vlgmr.msrb.gmra.mxu1 %vm137_vm3, %v915_v37 }
0x1072   :  { %v669_v38 = vpop.f32.mrf.mxu1 }
0x1073   :  { %v673_v50 = vrot.slane %v669_v38, 2 }
0x1075   :  { %v675_v53 = vadd.f32 %v673_v50, %v1768_v62 }
0x1077   :  { %v1404_v62 = vmul.f32 -1.442695, %v675_v53 }
0x1098   :  { %v935_v39 = vpop.f32.mrf.mxu1 }
0x1099   :  { %v939_v40 = vrot.slane %v935_v39, 4 }
0x109b   :  { %v941_v41 = vadd.f32 %v939_v40, %v1830_v46 }
0x109d   :  { %1508 = vtanh.f32 %v941_v41  ;;  %v1412_v44 = vmul.f32 -1.442695, %v941_v41 }
0x109f   :  { %1510 = vpow2.f32 %v1412_v44 }
0x10a3   :  { %v1509_v42 = vpop.eup %1508 }
0x10a4   :  { %967 = vrot.lane.b32.xlu2 %v1509_v42, %s1646_s29 }
0x10a5   :  { %v1511_v29 = vpop.eup %1510 }
0x10a6   :  { %v945_v31 = vadd.f32 1.0, %v1511_v29 }
0x10a8   :  { %1512 = vrcp.f32 %v945_v31  ;;  %v957_v48 = vand.u32 2147483648, %v945_v31  ;;  %vm951_vm6 = vweird.f32 %v945_v31  ;;  %v955_v49 = vand.u32 2147483647, %v945_v31 }
0x10a9   :  { %1514 = vtanh.f32 %v675_v53 }
0x10aa   :  { %v958_v52 = vor.u32 1.1754944e-38, %v957_v48  ;;  %vm956_vm7 = vcmp.eq.f32.partialorder %v955_v49, 8.507059e+37 }
0x10ae   :  { %v1513_v32 = vpop.eup %1512 }
0x10af   :  { %v947_v45 = vmul.f32 %v1513_v32, %v945_v31  ;;  %vm952_vm5 = vweird.f32 %v1513_v32  ;;  %v1515_v57 = vpop.eup %1514 }
0x10b0   :  { %vm953_vm2 = vmor %vm951_vm6, %vm952_vm5 }
0x10b1   :  { %v948_v34 = vsub.f32 1.0, %v947_v45 }
0x10b3   :  { %v949_v11 = vmul.f32 %v1513_v32, %v948_v34 }
0x10b5   :  { %v950_v47 = vadd.f32 %v1513_v32, %v949_v11 }
0x10b7   :  { %v954_v51 = vsel %vm953_vm2, %v1513_v32, %v950_v47 }
0x10b8   :  { %v959_v55 = vsel %vm956_vm7, %v958_v52, %v954_v51 }
0x10b9   :  { %v965_v59 = vmul.f32 %v963_v58, %v959_v55 }
0x10fe   :  { %v968_v54 = vpop.permute.xlu2 %967 }
0x10ff   :  { %v970_v56 = vmul.f32 %v968_v54, %v959_v55 }
0x1101   :  { %972 = vrot.lane.b32.xlu0 %v970_v56, %s1647_s30 }
0x1109   :  { %701 = vrot.lane.b32.xlu0 %v1515_v57, %s1646_s29 }
0x1173   :  { %v973_v60 = vpop.permute.xlu0 %972 }
0x1174   :  { %v1890_v61 = vadd.f32 %v973_v60, %v965_v59 }
0x1176   :  { %1516 = vtanh.f32 %v1890_v61  ;;  %v1037_v47 = vrot.slane %v1890_v61, 6 }
0x1177   :  { %1518 = vpow2.f32 %v1404_v62 }
0x117b   :  { %v702_v15 = vpop.permute.xlu0 %701 }
0x117c   :  { %v1517_v63 = vpop.eup %1516 }
0x117d   :  { %978 = vrot.lane.b32.xlu1 %v1517_v63, %s1646_s29  ;;  %v1519_v1 = vpop.eup %1518 }
0x117e   :  { %v679_v2 = vadd.f32 1.0, %v1519_v1 }
0x1180   :  { %1520 = vrcp.f32 %v679_v2  ;;  %v691_v9 = vand.u32 2147483648, %v679_v2  ;;  %vm685_vm9 = vweird.f32 %v679_v2  ;;  %v689_v13 = vand.u32 2147483647, %v679_v2 }
0x1182   :  { %v692_v16 = vor.u32 1.1754944e-38, %v691_v9  ;;  %vm690_vm14 = vcmp.eq.f32.partialorder %v689_v13, 8.507059e+37 }
0x1186   :  { %v1521_v3 = vpop.eup %1520 }
0x1187   :  { %v681_v4 = vmul.f32 %v1521_v3, %v679_v2  ;;  %vm686_vm8 = vweird.f32 %v1521_v3 }
0x1188   :  { %vm687_vm13 = vmor %vm685_vm9, %vm686_vm8 }
0x1189   :  { %v682_v5 = vsub.f32 1.0, %v681_v4 }
0x118b   :  { %v683_v6 = vmul.f32 %v1521_v3, %v682_v5 }
0x118d   :  { %v684_v10 = vadd.f32 %v1521_v3, %v683_v6 }
0x118f   :  { %v688_v14 = vsel %vm687_vm13, %v1521_v3, %v684_v10 }
0x1190   :  { %v693_v17 = vsel %vm690_vm14, %v692_v16, %v688_v14 }
0x1191   :  { %v704_v18 = vmul.f32 %v702_v15, %v693_v17  ;;  %v699_v22 = vmul.f32 %v697_v26, %v693_v17 }
0x11ef   :  { %v979_v7 = vpop.permute.xlu1 %978 }
0x11f0   :  { %v1894_v8 = vmul.f32 %v979_v7, %v959_v55 }
0x11f2   :  { %v987_v12 = vrot.slane %v1894_v8, 4 }
0x11f4   :  { %988 = vrot.lane.b32.xlu2 %v987_v12, %s1647_s30 }
0x11fc   :  { %706 = vrot.lane.b32.xlu2 %v704_v18, %s1647_s30 }
0x124e   :  { %v989_v20 = vpop.permute.xlu2 %988 }
0x124f   :  { %1413 = vmatmul.msk.f32.vlgmr.msrb.gmra.mxu3 %vm137_vm3, %v989_v20 }
0x1256   :  { %v707_v27 = vpop.permute.xlu2 %706 }
0x1257   :  { %v1902_v30 = vadd.f32 %v707_v27, %v699_v22 }
0x12d2   :  { %v1009_v23 = vpop.f32.mrf.mxu3 }
0x12d3   :  { %v1013_v24 = vrot.slane %v1009_v23, 2 }
0x12d5   :  { %v1015_v25 = vadd.f32 %v1013_v24, %v1830_v46 }
0x12d7   :  { %1522 = vtanh.f32 %v1015_v25  ;;  %v1414_v0 = vmul.f32 -1.442695, %v1015_v25 }
0x12d8   :  { %1524 = vtanh.f32 %v1902_v30 }
0x12d9   :  { %1526 = vpow2.f32 %v1414_v0 }
0x12dd   :  { %v1523_v33 = vpop.eup %1522 }
0x12de   :  { %1041 = vrot.lane.b32.xlu1 %v1523_v33, %s1646_s29  ;;  %v1525_v36 = vpop.eup %1524 }
0x12df   :  { %v1527_v46 = vpop.eup %1526 }
0x12e0   :  { %v1019_v19 = vadd.f32 1.0, %v1527_v46 }
0x12e2   :  { %1528 = vrcp.f32 %v1019_v19  ;;  %v1031_v42 = vand.u32 2147483648, %v1019_v19  ;;  %vm1025_vm1 = vweird.f32 %v1019_v19  ;;  %v1029_v44 = vand.u32 2147483647, %v1019_v19 }
0x12e4   :  { %v1032_v31 = vor.u32 1.1754944e-38, %v1031_v42  ;;  %vm1030_vm5 = vcmp.eq.f32.partialorder %v1029_v44, 8.507059e+37 }
0x12e6   :  { %712 = vrot.lane.b32.xlu1 %v1525_v36, %s1646_s29 }
0x12e8   :  { %v1529_v37 = vpop.eup %1528 }
0x12e9   :  { %v1021_v38 = vmul.f32 %v1529_v37, %v1019_v19  ;;  %vm1026_vm15 = vweird.f32 %v1529_v37 }
0x12ea   :  { %vm1027_vm4 = vmor %vm1025_vm1, %vm1026_vm15 }
0x12eb   :  { %v1022_v39 = vsub.f32 1.0, %v1021_v38 }
0x12ed   :  { %v1023_v40 = vmul.f32 %v1529_v37, %v1022_v39 }
0x12ee   :  { %643 = vrot.lane.b32.xlu1 %v1871_v21, %s1647_s30 }
0x12ef   :  { %v1024_v41 = vadd.f32 %v1529_v37, %v1023_v40 }
0x12f1   :  { %v1028_v29 = vsel %vm1027_vm4, %v1529_v37, %v1024_v41 }
0x12f2   :  { %v1033_v21 = vsel %vm1030_vm5, %v1032_v31, %v1028_v29 }
0x12f3   :  { %v1039_v48 = vmul.f32 %v1037_v47, %v1033_v21 }
0x1350   :  { %v1042_v32 = vpop.permute.xlu1 %1041 }
0x1351   :  { %v1044_v45 = vmul.f32 %v1042_v32, %v1033_v21 }
0x1353   :  { %1046 = vrot.lane.b32.xlu0 %v1044_v45, %s1647_s30 }
0x1358   :  { %v713_v34 = vpop.permute.xlu1 %712 }
0x1359   :  { %v715_v53 = vmul.f32 %v713_v34, %v693_v17 }
0x135b   :  { %569 = vrot.lane.b32.xlu0 %v1846_v28, %s1647_s30 }
0x1360   :  { %v644_v11 = vpop.permute.xlu1 %643 }
0x1361   :  { %646 = vst.msk [vmem:[#allocation6 + $0x8] sm:$0x30] %vm354_vm11, %v644_v11 }
0x13c5   :  { %v1047_v49 = vpop.permute.xlu0 %1046 }
0x13c6   :  { %v1049_v50 = vadd.f32 %v1047_v49, %v1039_v48 }
0x13c8   :  { %1530 = vtanh.f32 %v1049_v50  ;;  %v1108_v17 = vrot.slane %v1049_v50, 6 }
0x13cd   :  { %v570_v51 = vpop.permute.xlu0 %569 }
0x13ce   :  { %v1531_v52 = vpop.eup %1530  ;;  %572 = vst.msk [vmem:[#allocation6 + $0x8] sm:$0xc] %vm279_vm10, %v570_v51 }
0x13cf   :  { %1052 = vrot.lane.b32.xlu2 %v1531_v52, %s1646_s29 }
0x13d7   :  { %717 = vrot.lane.b32.xlu2 %v715_v53, %s1647_s30 }
0x1429   :  { %v1053_v54 = vpop.permute.xlu2 %1052 }
0x142a   :  { %v1917_v28 = vmul.f32 %v1053_v54, %v1033_v21 }
0x142c   :  { %v1061_v55 = vrot.slane %v1917_v28, 6 }
0x142e   :  { %1062 = vrot.lane.b32.xlu0 %v1061_v55, %s1647_s30 }
0x1431   :  { %v718_v56 = vpop.permute.xlu2 %717 }
0x1432   :  { %720 = vst.msk [vmem:[#allocation6 + $0x8] sm:$0xc0] %vm429_vm12, %v718_v56 }
0x1433   :  { %721 = vst.msk [vmem:[#allocation2 - $0x6] sm:$0xc0] %vm429_vm12, %v718_v56 }
0x1439   :  { %v728_v57 = vld [vmem:[#allocation6 + $0x8] sm:$0xff] }
0x143a   :  { %1406 = vmatmul.msk.f32.gmra.mxu2 %vm137_vm3, %v728_v57 }
0x14a0   :  { %v1063_v58 = vpop.permute.xlu0 %1062 }
0x14a1   :  { %1415 = vmatmul.msk.f32.vlgmr.msrb.gmra.mxu0 %vm137_vm3, %v1063_v58 }
0x14bd   :  { %v763_v59 = vpop.f32.mrf.mxu2 }
0x14be   :  { %v1926_v60 = vadd.f32 %v1827_v43, %v763_v59 }
0x151e   :  { %v1083_v61 = vpop.f32.mrf.mxu0 }
0x151f   :  { %v1086_v63 = vadd.f32 %v1083_v61, %v1926_v60 }
0x1521   :  { %1532 = vtanh.f32 %v1086_v63  ;;  %v1416_v1 = vmul.f32 -1.442695, %v1086_v63 }
0x1523   :  { %1534 = vpow2.f32 %v1416_v1 }
0x1527   :  { %v1533_v62 = vpop.eup %1532 }
0x1528   :  { %1112 = vrot.lane.b32.xlu1 %v1533_v62, %s1646_s29 }
0x1529   :  { %v1535_v2 = vpop.eup %1534 }
0x152a   :  { %v1090_v3 = vadd.f32 1.0, %v1535_v2 }
0x152c   :  { %1536 = vrcp.f32 %v1090_v3  ;;  %v1102_v43 = vand.u32 2147483648, %v1090_v3  ;;  %vm1096_vm2 = vweird.f32 %v1090_v3  ;;  %v1100_v12 = vand.u32 2147483647, %v1090_v3 }
0x152e   :  { %v1103_v13 = vor.u32 1.1754944e-38, %v1102_v43  ;;  %vm1101_vm8 = vcmp.eq.f32.partialorder %v1100_v12, 8.507059e+37 }
0x1532   :  { %v1537_v4 = vpop.eup %1536 }
0x1533   :  { %v1092_v5 = vmul.f32 %v1537_v4, %v1090_v3  ;;  %vm1097_vm6 = vweird.f32 %v1537_v4 }
0x1534   :  { %vm1098_vm7 = vmor %vm1096_vm2, %vm1097_vm6 }
0x1535   :  { %v1093_v6 = vsub.f32 1.0, %v1092_v5 }
0x1537   :  { %v1094_v7 = vmul.f32 %v1537_v4, %v1093_v6 }
0x1539   :  { %v1095_v10 = vadd.f32 %v1537_v4, %v1094_v7 }
0x153b   :  { %v1099_v9 = vsel %vm1098_vm7, %v1537_v4, %v1095_v10 }
0x153c   :  { %v1104_v15 = vsel %vm1101_vm8, %v1103_v13, %v1099_v9 }
0x153d   :  { %v1110_v18 = vmul.f32 %v1108_v17, %v1104_v15 }
0x159a   :  { %v1113_v14 = vpop.permute.xlu1 %1112 }
0x159b   :  { %v1115_v16 = vmul.f32 %v1113_v14, %v1104_v15 }
0x159d   :  { %1117 = vrot.lane.b32.xlu2 %v1115_v16, %s1647_s30 }
0x15f7   :  { %v1118_v20 = vpop.permute.xlu2 %1117 }
0x15f8   :  { %v1120_v23 = vadd.f32 %v1118_v20, %v1110_v18 }
0x15fa   :  { %1538 = vtanh.f32 %v1120_v23  ;;  %v1179_v11 = vrot.slane %v1120_v23, 6 }
0x1600   :  { %v1539_v24 = vpop.eup %1538 }
0x1601   :  { %1123 = vrot.lane.b32.xlu0 %v1539_v24, %s1646_s29 }
0x1673   :  { %v1124_v25 = vpop.permute.xlu0 %1123 }
0x1674   :  { %v1126_v26 = vmul.f32 %v1124_v25, %v1104_v15 }
0x1676   :  { %1128 = vrot.lane.b32.xlu1 %v1126_v26, %s1647_s30 }
0x16e8   :  { %v1129_v27 = vpop.permute.xlu1 %1128 }
0x16e9   :  { %1131 = vst.msk [vmem:[#allocation6 + $0x8] sm:$0x3] %vm85_vm0, %v1129_v27  ;;  %1417 = vmatmul.msk.f32.vlgmr.msra.gmra.mxu1 %vm137_vm3, %v1129_v27 }
0x1766   :  { %v1151_v22 = vpop.f32.mrf.mxu1 }
0x1767   :  { %v1155_v33 = vrot.slane %v1151_v22, 6 }
0x1769   :  { %v1157_v36 = vadd.f32 %v1155_v33, %v1926_v60 }
0x176b   :  { %1540 = vtanh.f32 %v1157_v36  ;;  %v1418_v46 = vmul.f32 -1.442695, %v1157_v36 }
0x176d   :  { %1542 = vpow2.f32 %v1418_v46 }
0x1771   :  { %v1541_v0 = vpop.eup %1540 }
0x1772   :  { %1183 = vrot.lane.b32.xlu2 %v1541_v0, %s1646_s29 }
0x1773   :  { %v1543_v19 = vpop.eup %1542 }
0x1774   :  { %v1161_v37 = vadd.f32 1.0, %v1543_v19 }
0x1776   :  { %1544 = vrcp.f32 %v1161_v37  ;;  %v1173_v44 = vand.u32 2147483648, %v1161_v37  ;;  %vm1167_vm9 = vweird.f32 %v1161_v37  ;;  %v1171_v29 = vand.u32 2147483647, %v1161_v37 }
0x1778   :  { %v1174_v32 = vor.u32 1.1754944e-38, %v1173_v44  ;;  %vm1172_vm14 = vcmp.eq.f32.partialorder %v1171_v29, 8.507059e+37 }
0x177c   :  { %v1545_v38 = vpop.eup %1544 }
0x177d   :  { %v1163_v39 = vmul.f32 %v1545_v38, %v1161_v37  ;;  %vm1168_vm0 = vweird.f32 %v1545_v38 }
0x177e   :  { %vm1169_vm13 = vmor %vm1167_vm9, %vm1168_vm0 }
0x177f   :  { %v1164_v40 = vsub.f32 1.0, %v1163_v39 }
0x1781   :  { %v1165_v41 = vmul.f32 %v1545_v38, %v1164_v40 }
0x1783   :  { %v1166_v42 = vadd.f32 %v1545_v38, %v1165_v41 }
0x1785   :  { %v1170_v31 = vsel %vm1169_vm13, %v1545_v38, %v1166_v42 }
0x1786   :  { %v1175_v45 = vsel %vm1172_vm14, %v1174_v32, %v1170_v31 }
0x1787   :  { %v1181_v47 = vmul.f32 %v1179_v11, %v1175_v45 }
0x17cc   :  { %v1184_v21 = vpop.permute.xlu2 %1183 }
0x17cd   :  { %v1186_v34 = vmul.f32 %v1184_v21, %v1175_v45 }
0x17cf   :  { %1188 = vrot.lane.b32.xlu0 %v1186_v34, %s1647_s30 }
0x1841   :  { %v1189_v48 = vpop.permute.xlu0 %1188 }
0x1842   :  { %v1191_v49 = vadd.f32 %v1189_v48, %v1181_v47 }
0x1844   :  { %1546 = vtanh.f32 %v1191_v49  ;;  %v1253_v13 = vrot.slane %v1191_v49, 6 }
0x184a   :  { %v1547_v50 = vpop.eup %1546 }
0x184b   :  { %1194 = vrot.lane.b32.xlu1 %v1547_v50, %s1646_s29 }
0x18bd   :  { %v1195_v51 = vpop.permute.xlu1 %1194 }
0x18be   :  { %v1197_v52 = vmul.f32 %v1195_v51, %v1175_v45 }
0x18c0   :  { %v1203_v53 = vrot.slane %v1197_v52, 2 }
0x18c2   :  { %1204 = vrot.lane.b32.xlu2 %v1203_v53, %s1647_s30 }
0x191c   :  { %v1205_v54 = vpop.permute.xlu2 %1204 }
0x191d   :  { %1419 = vmatmul.msk.f32.vlgmr.msrb.gmra.mxu2 %vm137_vm3, %v1205_v54 }
0x19a0   :  { %v1225_v55 = vpop.f32.mrf.mxu2 }
0x19a1   :  { %v1229_v56 = vrot.slane %v1225_v55, 4 }
0x19a3   :  { %v1231_v57 = vadd.f32 %v1229_v56, %v1926_v60 }
0x19a5   :  { %1548 = vtanh.f32 %v1231_v57  ;;  %v1420_v59 = vmul.f32 -1.442695, %v1231_v57 }
0x19a7   :  { %1550 = vpow2.f32 %v1420_v59  ;;  %v1435_v59 = vld [vmem:[#allocation7] ss:$0 sm:$0xff] }
0x19ab   :  { %v1549_v58 = vpop.eup %1548 }
0x19ac   :  { %1257 = vrot.lane.b32.xlu0 %v1549_v58, %s1646_s29 }
0x19ad   :  { %v1551_v61 = vpop.eup %1550 }
0x19ae   :  { %v1235_v63 = vadd.f32 1.0, %v1551_v61 }
0x19b0   :  { %1552 = vrcp.f32 %v1235_v63  ;;  %v1247_v5 = vand.u32 2147483648, %v1235_v63  ;;  %vm1241_vm1 = vweird.f32 %v1235_v63  ;;  %v1245_v6 = vand.u32 2147483647, %v1235_v63 }
0x19b2   :  { %v1248_v10 = vor.u32 1.1754944e-38, %v1247_v5  ;;  %vm1246_vm5 = vcmp.eq.f32.partialorder %v1245_v6, 8.507059e+37 }
0x19b6   :  { %v1553_v62 = vpop.eup %1552 }
0x19b7   :  { %v1237_v1 = vmul.f32 %v1553_v62, %v1235_v63  ;;  %vm1242_vm15 = vweird.f32 %v1553_v62 }
0x19b8   :  { %vm1243_vm4 = vmor %vm1241_vm1, %vm1242_vm15 }
0x19b9   :  { %v1238_v2 = vsub.f32 1.0, %v1237_v1 }
0x19bb   :  { %v1239_v3 = vmul.f32 %v1553_v62, %v1238_v2 }
0x19bd   :  { %v1240_v4 = vadd.f32 %v1553_v62, %v1239_v3 }
0x19bf   :  { %v1244_v7 = vsel %vm1243_vm4, %v1553_v62, %v1240_v4 }
0x19c0   :  { %v1249_v12 = vsel %vm1246_vm5, %v1248_v10, %v1244_v7 }
0x19c1   :  { %v1255_v14 = vmul.f32 %v1253_v13, %v1249_v12 }
0x1a1e   :  { %v1258_v43 = vpop.permute.xlu0 %1257 }
0x1a1f   :  { %v1260_v9 = vmul.f32 %v1258_v43, %v1249_v12 }
0x1a21   :  { %1262 = vrot.lane.b32.xlu1 %v1260_v9, %s1647_s30 }
0x1a93   :  { %v1263_v15 = vpop.permute.xlu1 %1262 }
0x1a94   :  { %v1265_v16 = vadd.f32 %v1263_v15, %v1255_v14 }
0x1a96   :  { %1554 = vtanh.f32 %v1265_v16  ;;  %v1327_v21 = vrot.slane %v1265_v16, 6 }
0x1a9c   :  { %v1555_v17 = vpop.eup %1554 }
0x1a9d   :  { %1268 = vrot.lane.b32.xlu2 %v1555_v17, %s1646_s29 }
0x1af7   :  { %v1269_v18 = vpop.permute.xlu2 %1268 }
0x1af8   :  { %v1271_v20 = vmul.f32 %v1269_v18, %v1249_v12 }
0x1afa   :  { %v1277_v23 = vrot.slane %v1271_v20, 4 }
0x1afc   :  { %1278 = vrot.lane.b32.xlu0 %v1277_v23, %s1647_s30 }
0x1b6e   :  { %v1279_v24 = vpop.permute.xlu0 %1278 }
0x1b6f   :  { %1421 = vmatmul.msk.f32.vlgmr.msra.gmra.mxu3 %vm137_vm3, %v1279_v24 }
0x1bf2   :  { %v1299_v25 = vpop.f32.mrf.mxu3 }
0x1bf3   :  { %v1303_v26 = vrot.slane %v1299_v25, 2 }
0x1bf5   :  { %v1305_v27 = vadd.f32 %v1303_v26, %v1926_v60 }
0x1bf7   :  { %1556 = vtanh.f32 %v1305_v27  ;;  %v1422_v33 = vmul.f32 -1.442695, %v1305_v27 }
0x1bf9   :  { %1558 = vpow2.f32 %v1422_v33 }
0x1bfd   :  { %v1557_v22 = vpop.eup %1556 }
0x1bfe   :  { %1331 = vrot.lane.b32.xlu1 %v1557_v22, %s1646_s29 }
0x1bff   :  { %v1559_v36 = vpop.eup %1558 }
0x1c00   :  { %v1309_v0 = vadd.f32 1.0, %v1559_v36 }
0x1c02   :  { %1560 = vrcp.f32 %v1309_v0  ;;  %v1321_v60 = vand.u32 2147483648, %v1309_v0  ;;  %vm1315_vm2 = vweird.f32 %v1309_v0  ;;  %v1319_v40 = vand.u32 2147483647, %v1309_v0 }
0x1c04   :  { %v1322_v42 = vor.u32 1.1754944e-38, %v1321_v60  ;;  %vm1320_vm8 = vcmp.eq.f32.partialorder %v1319_v40, 8.507059e+37 }
0x1c06   :  { %909 = vrot.lane.b32.xlu1 %v1875_v35, %s1647_s30 }
0x1c08   :  { %v1561_v46 = vpop.eup %1560 }
0x1c09   :  { %v1311_v19 = vmul.f32 %v1561_v46, %v1309_v0  ;;  %vm1316_vm6 = vweird.f32 %v1561_v46 }
0x1c0a   :  { %vm1317_vm7 = vmor %vm1315_vm2, %vm1316_vm6 }
0x1c0b   :  { %v1312_v37 = vsub.f32 1.0, %v1311_v19 }
0x1c0d   :  { %v1313_v38 = vmul.f32 %v1561_v46, %v1312_v37 }
0x1c0e   :  { %1199 = vrot.lane.b32.xlu1 %v1197_v52, %s1647_s30  ;;  %v1434_v52 = vld [vmem:[%s1988_s7] ss:$0 sm:$0xff] }
0x1c0f   :  { %v1314_v39 = vadd.f32 %v1561_v46, %v1313_v38 }
0x1c11   :  { %v1318_v41 = vsel %vm1317_vm7, %v1561_v46, %v1314_v39 }
0x1c12   :  { %v1323_v44 = vsel %vm1320_vm8, %v1322_v42, %v1318_v41 }
0x1c13   :  { %v1329_v45 = vmul.f32 %v1327_v21, %v1323_v44 }
0x1c70   :  { %v1332_v35 = vpop.permute.xlu1 %1331 }
0x1c71   :  { %v1334_v29 = vmul.f32 %v1332_v35, %v1323_v44 }
0x1c73   :  { %1336 = vrot.lane.b32.xlu2 %v1334_v29, %s1647_s30 }
0x1c78   :  { %v910_v31 = vpop.permute.xlu1 %909 }
0x1c79   :  { %912 = vst.msk [vmem:[#allocation6] sm:$0xc] %vm279_vm10, %v910_v31 }
0x1c7b   :  { %983 = vrot.lane.b32.xlu2 %v1894_v8, %s1647_s30 }
0x1c80   :  { %v1200_v32 = vpop.permute.xlu1 %1199 }
0x1c81   :  { %1202 = vst.msk [vmem:[#allocation6 + $0x8] sm:$0xc] %vm279_vm10, %v1200_v32  ;;  %vm1377_vm10 = vcmask 7168  }
0x1c83   :  { %1273 = vrot.lane.b32.xlu2 %v1271_v20, %s1647_s30 }
0x1ccd   :  { %v1337_v34 = vpop.permute.xlu2 %1336 }
0x1cce   :  { %v1339_v11 = vadd.f32 %v1337_v34, %v1329_v45 }
0x1cd0   :  { %1562 = vtanh.f32 %v1339_v11 }
0x1cd5   :  { %v984_v47 = vpop.permute.xlu2 %983 }
0x1cd6   :  { %v1563_v48 = vpop.eup %1562  ;;  %986 = vst.msk [vmem:[#allocation6] sm:$0x30] %vm354_vm11, %v984_v47 }
0x1cd7   :  { %1342 = vrot.lane.b32.xlu0 %v1563_v48, %s1646_s29 }
0x1cdd   :  { %v1274_v49 = vpop.permute.xlu2 %1273 }
0x1cde   :  { %1276 = vst.msk [vmem:[#allocation6 + $0x8] sm:$0x30] %vm354_vm11, %v1274_v49 }
0x1cdf   :  { %1057 = vrot.lane.b32.xlu0 %v1917_v28, %s1647_s30 }
0x1d49   :  { %v1343_v8 = vpop.permute.xlu0 %1342 }
0x1d4a   :  { %v1345_v50 = vmul.f32 %v1343_v8, %v1323_v44 }
0x1d4c   :  { %1347 = vrot.lane.b32.xlu0 %v1345_v50, %s1647_s30 }
0x1d51   :  { %v1058_v51 = vpop.permute.xlu0 %1057 }
0x1d52   :  { %1060 = vst.msk [vmem:[#allocation6] sm:$0xc0] %vm429_vm12, %v1058_v51 }
0x1d54   :  { %723 = vrot.lane.b32.xlu0 %v1902_v30, %s1648_s5 }
0x1d59   :  { %v1357_v53 = vld [vmem:[#allocation6] sm:$0xff] }
0x1d5a   :  { %v1363_v54 = vmul.f32 %v1434_v52, %v1357_v53 }
0x1d5c   :  { %1353 = vrot.lane.b32.xlu0 %v1339_v11, %s1648_s5  ;;  %v1365_v55 = vsel %vm137_vm3, %v1363_v54, 0.0 }
0x1d5d   :  { %1366 = vadd.xlane.f32.xlu1 %v1365_v55 }
0x1dbe   :  { %v1348_v28 = vpop.permute.xlu0 %1347 }
0x1dbf   :  { %1350 = vst.msk [vmem:[#allocation6 + $0x8] sm:$0xc0] %vm429_vm12, %v1348_v28 }
0x1dc0   :  { %1351 = vst.msk [vmem:[#allocation4 - $0x6] sm:$0xc0] %vm429_vm12, %v1348_v28 }
0x1dc6   :  { %v724_v56 = vpop.permute.xlu0 %723  ;;  %v1358_v57 = vld [vmem:[#allocation6 + $0x8] sm:$0xff] }
0x1dc7   :  { %726 = vst.msk [vmem:[#allocation3 - $0x6] sm:$0xc0] %vm429_vm12, %v724_v56  ;;  %v1364_v30 = vmul.f32 %v1434_v52, %v1358_v57 }
0x1dc9   :  { %v1368_v58 = vsel %vm137_vm3, %v1364_v30, 0.0 }
0x1dca   :  { %1369 = vadd.xlane.f32.xlu2 %v1368_v58 }
0x1dce   :  { %v1354_v61 = vpop.permute.xlu0 %1353 }
0x1dcf   :  { %1356 = vst.msk [vmem:[#allocation5 - $0x6] sm:$0xc0] %vm429_vm12, %v1354_v61 }
0x1dd0   :  { %v1367_v63 = vpop.xlane.xlu1 %1366 }
0x1dd1   :  { %v1375_v62 = vadd.f32 %v1435_v59, %v1367_v63 }
0x1dd3   :  { %1378 = vst.msk [vmem:[%s1990_s9] sm:$0xff] %vm1377_vm10, %v1375_v62 }
0x1e3d   :  { %v1370_v1 = vpop.xlane.xlu2 %1369 }
0x1e3e   :  { %v1376_v2 = vadd.f32 %v1435_v59, %v1370_v1 }
0x1e40   :  { %1379 = vst.msk [vmem:[%s1990_s9 + $0x8] sm:$0xff] %vm1377_vm10, %v1376_v2 }
0x1e41   :  { %1384 = vsyncpa [#allocation9], 1 }
0x1e42   :  { %1385 = vsyncpa [#allocation11], 1 }

</bundles_post_ra>
